<compile_context>
chip_gen: v5e
topology: v5e:2x2
jax: 0.10.0
libtpu: 0.0.40
codegen_flags: <defaults>
</compile_context>

<pallas_src>
import functools

import jax
import jax.numpy as jnp
from jax.experimental import pallas as pl
from jax.experimental.pallas import tpu as pltpu  # noqa: F401  (TPU-specific knobs when scaling)

BF16 = jnp.bfloat16
F32 = jnp.float32


# ----------------------------- shared cell math -----------------------------

def _lstm_cell(gates, c):
    """gates: (B, 4H) f32.  2 EUP pushes over the full gate vreg (+1 for tanh(c))
    instead of 5 per step; all elementwise math stays f32."""
    H = gates.shape[-1] // 4
    sg = jax.nn.sigmoid(gates)
    tg = jnp.tanh(gates)
    i = sg[:, 0 * H:1 * H]
    f = sg[:, 1 * H:2 * H]
    g = tg[:, 2 * H:3 * H]
    o = sg[:, 3 * H:4 * H]
    c_new = f * c + i * g
    h_new = o * jnp.tanh(c_new)
    return h_new, c_new


# ----------------------------- Pallas kernels -----------------------------

def _lstm_layer_kernel(x_ref, w_ih_ref, w_hh_ref, b_ref, *rest, zero_state):
    """One whole LSTM layer per kernel invocation (batch-major in/out)."""
    if zero_state:
        out_ref, hT_ref = rest
    else:
        h0_ref, c0_ref, out_ref, hT_ref = rest
    B, T, Din = x_ref.shape
    H = w_hh_ref.shape[0]

    # Hoisted input projection: ONE bf16 (B*T, Din) @ (Din, 4H) MXU pass off the
    # serial recurrence (f32 accumulation).
    gx = (jnp.dot(x_ref[...].reshape(B * T, Din).astype(BF16), w_ih_ref[...],
                  preferred_element_type=F32) + b_ref[...]).reshape(B, T, 4 * H)

    w_hh = w_hh_ref[...]                          # bf16, resident for the whole recurrence
    if zero_state:
        h = jnp.zeros((B, H), F32)
        c = jnp.zeros((B, H), F32)
    else:
        h = h0_ref[...]
        c = c0_ref[...]

    hs = []
    for t in range(T):                            # T small & static -> fully unrolled
        if zero_state and t == 0:
            gates = gx[:, 0, :]                   # h == 0 -> skip the first h @ W_hh
        else:
            gates = gx[:, t, :] + jnp.dot(h.astype(BF16), w_hh,
                                          preferred_element_type=F32)
        h, c = _lstm_cell(gates, c)
        hs.append(h)

    # Single lane-dense (B, T*H) store (unmasked vst) instead of T masked sub-vreg stores.
    out_ref[...] = jnp.concatenate(hs, axis=1)
    hT_ref[...] = h


def pallas_lstm_layer(x_bm, w_ih, w_hh, b, h0=None, c0=None):
    """x_bm: (B, T, Din) -> ((B, T*H) lane-dense hidden sequence, (B, H) h_T)."""
    B, T, _ = x_bm.shape
    H = w_hh.shape[0]
    zero_state = h0 is None
    kern = functools.partial(_lstm_layer_kernel, zero_state=zero_state)
    out_shape = (jax.ShapeDtypeStruct((B, T * H), F32),
                 jax.ShapeDtypeStruct((B, H), F32))
    args = (x_bm, w_ih, w_hh, b) if zero_state else (x_bm, w_ih, w_hh, b, h0, c0)
    return pl.pallas_call(kern, out_shape=out_shape)(*args)


def _dec_fused_kernel(hT_ref, w_muv_ref, b_muv_ref, eps_ref, lemb_ref,
                      w_hz_ref, w_he_ref, b_hc_ref, w_hh_ref, b_ref, *rest,
                      T, latent, dec_h, act, has_inputs):
    """mu/logvar + reparameterize + lat2h/lat2c + activation + first decoder LSTM layer."""
    if has_inputs:
        x_ref, w_ih_ref, out_ref, mu_ref, lv_ref, h0_ref, c0_ref = rest
    else:
        out_ref, mu_ref, lv_ref, h0_ref, c0_ref = rest
    B = hT_ref.shape[0]
    H = dec_h

    # ---- latent prologue (was 2 pallas_linear launches + ~6 interleaved XLA ops) ----
    stats = (jnp.dot(hT_ref[...].astype(BF16), w_muv_ref[...],
                     preferred_element_type=F32) + b_muv_ref[...])
    mu = stats[:, :latent]
    logvar = stats[:, latent:]
    mu_ref[...] = mu
    lv_ref[...] = logvar

    z = mu + eps_ref[...] * jnp.exp(0.5 * logvar)          # reparameterize (eps passed in)

    # latent -> (h0 | c0); split weights avoid an in-kernel concat(z, label_emb).
    hc = (jnp.dot(z.astype(BF16), w_hz_ref[...], preferred_element_type=F32)
          + jnp.dot(lemb_ref[...].astype(BF16), w_he_ref[...], preferred_element_type=F32)
          + b_hc_ref[...])
    if act == 'tanh':
        hc = jnp.tanh(hc)
    elif act == 'relu':
        hc = jax.nn.relu(hc)
    elif act == 'sigmoid':
        hc = jax.nn.sigmoid(hc)
    # TODO(synk): other torch.nn.functional decoder activations are not mapped here.
    h = hc[:, :H]
    c = hc[:, H:]
    h0_ref[...] = h
    c0_ref[...] = c

    # ---- first decoder LSTM layer ----
    w_hh = w_hh_ref[...]                                   # bf16 (H, 4H)
    b = b_ref[...]                                         # (1, 4H) f32
    if has_inputs:
        Din = x_ref.shape[-1]
        gx = (jnp.dot(x_ref[...].reshape(B * T, Din).astype(BF16), w_ih_ref[...],
                      preferred_element_type=F32) + b).reshape(B, T, 4 * H)
    hs = []
    for t in range(T):
        # inputs is None -> decoder input is all-zeros: x@W_ih vanishes, only the bias
        # remains (no zeros DMA, no wasted MXU pass).
        g_in = gx[:, t, :] if has_inputs else b
        gates = g_in + jnp.dot(h.astype(BF16), w_hh, preferred_element_type=F32)
        h, c = _lstm_cell(gates, c)
        hs.append(h)
    out_ref[...] = jnp.concatenate(hs, axis=1)             # (B, T*H) lane-dense


def _attn_out_kernel(enc_ref, dec_ref, we_ref, be_ref, wd_ref, bd_ref, v_ref,
                     wo_dec_ref, wo_ctx_ref, bo_ref, out_ref, *, batch):
    """Batched additive attention + hidden_to_output_fc (split weights), whole batch."""
    B = batch
    He = enc_ref.shape[-1]
    Te = enc_ref.shape[0] // B
    Td = dec_ref.shape[0] // B
    A = we_ref.shape[-1]

    enc2 = enc_ref[...]                                    # (B*Te, He)
    dec2 = dec_ref[...]                                    # (B*Td, Hd)

    # Attention projections batched over the whole batch*time slab (bf16 MXU, f32 acc).
    enc_a = (jnp.dot(enc2.astype(BF16), we_ref[...], preferred_element_type=F32)
             + be_ref[...])                                # (B*Te, A)
    dec_a = (jnp.dot(dec2.astype(BF16), wd_ref[...], preferred_element_type=F32)
             + bd_ref[...])                                # (B*Td, A)

    # Fully batched additive energy: no per-b Python unrolling, no context concat.
    energy = jnp.tanh(dec_a.reshape(B, Td, 1, A) + enc_a.reshape(B, 1, Te, A))
    # A=16 reduction kept as multiply+sum: negligible at these sizes and avoids a
    # (.,1)->(.,Te) relayout that the v-matmul formulation would need.
    scores = jnp.sum(energy * v_ref[...], axis=-1)         # (B, Td, Te)
    scores = scores - jnp.max(scores, axis=-1, keepdims=True)
    p = jnp.exp(scores)
    attn_w = p * pl.reciprocal(jnp.sum(p, axis=-1, keepdims=True), approx=True)

    ctx = jnp.einsum('bqk,bkd->bqd', attn_w.astype(BF16),
                     enc2.reshape(B, Te, He).astype(BF16),
                     preferred_element_type=F32)           # (B, Td, He)

    # Fused hidden_to_output_fc on [decoder | context] via split weights.
    # TODO(synk): dropout_fc is identity (eval-mode forward).
    out_ref[...] = (jnp.dot(dec2.astype(BF16), wo_dec_ref[...], preferred_element_type=F32)
                    + jnp.dot(ctx.reshape(B * Td, He).astype(BF16), wo_ctx_ref[...],
                              preferred_element_type=F32)
                    + bo_ref[...])


def pallas_attention_output(enc2d, dec2d, we, be, wd, bd, v, wo_dec, wo_ctx, bo, batch):
    kern = functools.partial(_attn_out_kernel, batch=batch)
    return pl.pallas_call(
        kern,
        out_shape=jax.ShapeDtypeStruct((dec2d.shape[0], bo.shape[1]), F32),
    )(enc2d, dec2d, we, be, wd, bd, v, wo_dec, wo_ctx, bo)


def _linear_kernel(x_ref, w_ref, b_ref, o_ref):
    o_ref[...] = (jnp.dot(x_ref[...].astype(BF16), w_ref[...],
                          preferred_element_type=F32) + b_ref[...])


def pallas_linear(x, w, b):
    return pl.pallas_call(
        _linear_kernel,
        out_shape=jax.ShapeDtypeStruct((x.shape[0], w.shape[1]), F32),
    )(x, w, b)


# ------------------------- parameters (deterministic) -------------------------

def _uniform(key, shape, bound):
    return jax.random.uniform(key, shape, F32, -bound, bound)


def init_params(key, in_size, enc_h, dec_h, attn_size, latent, num_layers,
                num_labels, num_modes):
    keys = iter(jax.random.split(key, 64))

    def lin_raw(din, dout):
        bnd = float(din) ** -0.5
        return (_uniform(next(keys), (din, dout), bnd),
                _uniform(next(keys), (1, dout), bnd))

    def lstm(din, h):
        # NOTE: PyTorch draws b_ih and b_hh independently and sums them; a single
        # U(-1/sqrt(h), 1/sqrt(h)) draw stands in here.  Load checkpoints as b_ih + b_hh.
        bnd = float(h) ** -0.5
        layers = []
        for l in range(num_layers):
            d = din if l == 0 else h
            layers.append((_uniform(next(keys), (d, 4 * h), bnd).astype(BF16),   # W_ih^T
                           _uniform(next(keys), (h, 4 * h), bnd).astype(BF16),   # W_hh^T
                           _uniform(next(keys), (1, 4 * h), bnd)))               # bias (f32)
        return layers

    out_dim = 8 * num_modes + 3

    # mu|logvar fused once at init (hoisted concat).
    w_mu, b_mu = lin_raw(enc_h, latent)
    w_lv, b_lv = lin_raw(enc_h, latent)
    muv = (jnp.concatenate([w_mu, w_lv], axis=1).astype(BF16),
           jnp.concatenate([b_mu, b_lv], axis=1))

    # lat2h|lat2c fused, then split by input rows (z | label_emb).
    w_h, b_h = lin_raw(latent * 2, dec_h)
    w_c, b_c = lin_raw(latent * 2, dec_h)
    w_hc = jnp.concatenate([w_h, w_c], axis=1)             # (2*latent, 2*dec_h)
    lat2hc = (w_hc[:latent].astype(BF16),                  # rows acting on z
              w_hc[latent:].astype(BF16),                  # rows acting on label_emb
              jnp.concatenate([b_h, b_c], axis=1))

    p = {
        'enc_lstm': lstm(in_size, enc_h),
        'dec_lstm': lstm(in_size, dec_h),
        'muv': muv,
        'lat2hc': lat2hc,
        'label_emb': jax.random.normal(next(keys), (num_labels, latent), F32),
    }
    if attn_size > 0:
        w_o, b_o = lin_raw(enc_h + dec_h, out_dim)
        p['out_fc'] = (w_o[:dec_h].astype(BF16),           # decoder half
                       w_o[dec_h:].astype(BF16),           # context half
                       b_o)
        w_e, b_e = lin_raw(enc_h, attn_size)
        w_d, b_d = lin_raw(dec_h, attn_size)
        p['attn_enc'] = (w_e.astype(BF16), b_e)
        p['attn_dec'] = (w_d.astype(BF16), b_d)
        p['attn_v'] = _uniform(next(keys), (1, attn_size), float(attn_size) ** -0.5)
    else:
        w_o, b_o = lin_raw(dec_h, out_dim)
        p['out_fc'] = (w_o.astype(BF16), b_o)
    return p


# ------------------------------ forward pass ------------------------------

_SUPPORTED_ACTS = ('tanh', 'relu', 'sigmoid', 'none')


def doodle_gen_rnn_forward(params, x, seq_len, labels, eps_key, attn_size,
                           decoder_activation='tanh', inputs=None):
    B, Te, _ = x.shape
    enc_h = params['enc_lstm'][-1][1].shape[0]
    dec_h = params['dec_lstm'][-1][1].shape[0]
    latent = params['muv'][0].shape[1] // 2
    act = decoder_activation.lower()
    assert act in _SUPPORTED_ACTS

    # ---- encoder: one launch per LSTM layer, batch-major, lane-dense outputs ----
    seq = x
    hn = None
    seq_flat = None
    for (w_ih, w_hh, b) in params['enc_lstm']:
        seq_flat, hn = pallas_lstm_layer(seq, w_ih, w_hh, b)        # zero initial state
        seq = seq_flat.reshape(B, Te, w_hh.shape[0])                # free row-major reshape
    encoder_output_2d = seq_flat.reshape(B * Te, enc_h)

    # ---- fused: mu/logvar + reparameterize + lat2h/lat2c + act + decoder layer 0 ----
    eps = jax.random.normal(eps_key, (B, latent), F32)
    label_emb = jnp.take(params['label_emb'], labels, axis=0)
    w_muv, b_muv = params['muv']
    w_hz, w_he, b_hc = params['lat2hc']
    w_ih0, w_hh0, b0 = params['dec_lstm'][0]
    has_inputs = inputs is not None
    Td = inputs.shape[1] if has_inputs else seq_len

    kern = functools.partial(_dec_fused_kernel, T=Td, latent=latent, dec_h=dec_h,
                             act=act, has_inputs=has_inputs)
    out_shapes = (jax.ShapeDtypeStruct((B, Td * dec_h), F32),
                  jax.ShapeDtypeStruct((B, latent), F32),
                  jax.ShapeDtypeStruct((B, latent), F32),
                  jax.ShapeDtypeStruct((B, dec_h), F32),
                  jax.ShapeDtypeStruct((B, dec_h), F32))
    args = [hn, w_muv, b_muv, eps, label_emb, w_hz, w_he, b_hc, w_hh0, b0]
    if has_inputs:
        args += [inputs, w_ih0]
    dec_flat, mu, logvar, h0, c0 = pl.pallas_call(kern, out_shape=out_shapes)(*args)

    # ---- remaining decoder layers (h0/c0 repeated per layer; eval-mode dropout = id) ----
    for (w_ih, w_hh, b) in params['dec_lstm'][1:]:
        dec_flat, _ = pallas_lstm_layer(dec_flat.reshape(B, Td, dec_h),
                                        w_ih, w_hh, b, h0, c0)
    decoder_output_2d = dec_flat.reshape(B * Td, dec_h)

    # ---- attention + output head in one launch ----
    if attn_size > 0:
        we, be = params['attn_enc']
        wd, bd = params['attn_dec']
        wo_dec, wo_ctx, bo = params['out_fc']
        out2d = pallas_attention_output(encoder_output_2d, decoder_output_2d,
                                        we, be, wd, bd, params['attn_v'],
                                        wo_dec, wo_ctx, bo, B)
    else:
        wo, bo = params['out_fc']
        out2d = pallas_linear(decoder_output_2d, wo, bo)

    return out2d.reshape(B, Td, -1), mu, logvar


# ----------------------------------- main -----------------------------------

if __name__ == "__main__":
    IN_SIZE, ENC_H, DEC_H = 5, 32, 32
    ATTN, LATENT = 16, 16
    NUM_LAYERS, NUM_LABELS, NUM_MODES = 1, 4, 4
    B, T_ENC, SEQ_LEN = 2, 8, 8

    root = jax.random.PRNGKey(0)
    k_param, k_x, k_eps = jax.random.split(root, 3)

    params = init_params(k_param, IN_SIZE, ENC_H, DEC_H, ATTN, LATENT,
                         NUM_LAYERS, NUM_LABELS, NUM_MODES)
    x = jax.random.normal(k_x, (B, T_ENC, IN_SIZE), F32)
    labels = jnp.array([1, 3], dtype=jnp.int32)

    out, mu, logvar = doodle_gen_rnn_forward(
        params, x, SEQ_LEN, labels, k_eps, ATTN, decoder_activation='tanh')
    jax.block_until_ready((out, mu, logvar))

    assert out.shape == (B, SEQ_LEN, 8 * NUM_MODES + 3)
    assert mu.shape == (B, LATENT) and logvar.shape == (B, LATENT)
    print("KERNEL_OK")
</pallas_src>

<mosaic_0001>
module attributes {stable_mosaic.version = 11 : i64} {
  func.func @_lstm_layer_kernel(%arg0: memref<2x8x5xf32, #tpu.memory_space<vmem>>, %arg1: memref<5x128xbf16, #tpu.memory_space<vmem>>, %arg2: memref<32x128xbf16, #tpu.memory_space<vmem>>, %arg3: memref<1x128xf32, #tpu.memory_space<vmem>>, %arg4: memref<2x256xf32, #tpu.memory_space<vmem>>, %arg5: memref<2x32xf32, #tpu.memory_space<vmem>>) attributes {dimension_semantics = [], scalar_prefetch = 0 : i64, scratch_operands = 0 : i64, tpu.core_type = #tpu.core_type<tc>} {
    %c0 = arith.constant 0 : index
    %c0_0 = arith.constant 0 : index
    %c0_1 = arith.constant 0 : index
    %0 = vector.load %arg0[%c0, %c0_0, %c0_1] : memref<2x8x5xf32, #tpu.memory_space<vmem>>, vector<2x8x5xf32>
    %1 = vector.shape_cast %0 : vector<2x8x5xf32> to vector<16x5xf32>
    %2 = arith.truncf %1 : vector<16x5xf32> to vector<16x5xbf16>
    %c0_2 = arith.constant 0 : index
    %c0_3 = arith.constant 0 : index
    %3 = vector.load %arg1[%c0_2, %c0_3] : memref<5x128xbf16, #tpu.memory_space<vmem>>, vector<5x128xbf16>
    %cst = arith.constant dense<0.000000e+00> : vector<16x128xf32>
    %4 = tpu.matmul %2, %3, %cst {dimension_numbers = #tpu.dot_dimension_numbers<[1], [0], [0], [1], [0, 0, 1, 1], [], []>} : vector<16x5xbf16>, vector<5x128xbf16>, vector<16x128xf32> -> vector<16x128xf32>
    %c0_4 = arith.constant 0 : index
    %c0_5 = arith.constant 0 : index
    %5 = vector.load %arg3[%c0_4, %c0_5] : memref<1x128xf32, #tpu.memory_space<vmem>>, vector<1x128xf32>
    %6 = vector.broadcast %5 : vector<1x128xf32> to vector<16x128xf32>
    %7 = arith.addf %4, %6 : vector<16x128xf32>
    %8 = vector.shape_cast %7 : vector<16x128xf32> to vector<2x8x128xf32>
    %c0_6 = arith.constant 0 : index
    %c0_7 = arith.constant 0 : index
    %9 = vector.load %arg2[%c0_6, %c0_7] : memref<32x128xbf16, #tpu.memory_space<vmem>>, vector<32x128xbf16>
    %cst_8 = arith.constant 0.000000e+00 : f32
    %10 = vector.broadcast %cst_8 : f32 to vector<2x32xf32>
    %11 = vector.extract_strided_slice %8 {offsets = [0, 0, 0], sizes = [2, 1, 128], strides = [1, 1, 1]} : vector<2x8x128xf32> to vector<2x1x128xf32>
    %12 = vector.shape_cast %11 : vector<2x1x128xf32> to vector<2x128xf32>
    %13 = arith.negf %12 : vector<2x128xf32>
    %14 = math.exp %13 : vector<2x128xf32>
    %cst_9 = arith.constant 1.000000e+00 : f32
    %15 = vector.broadcast %cst_9 : f32 to vector<2x128xf32>
    %16 = arith.addf %15, %14 : vector<2x128xf32>
    %17 = arith.divf %15, %16 : vector<2x128xf32>
    %18 = math.tanh %12 : vector<2x128xf32>
    %19 = vector.extract_strided_slice %17 {offsets = [0, 0], sizes = [2, 32], strides = [1, 1]} : vector<2x128xf32> to vector<2x32xf32>
    %20 = vector.extract_strided_slice %17 {offsets = [0, 32], sizes = [2, 32], strides = [1, 1]} : vector<2x128xf32> to vector<2x32xf32>
    %21 = vector.extract_strided_slice %18 {offsets = [0, 64], sizes = [2, 32], strides = [1, 1]} : vector<2x128xf32> to vector<2x32xf32>
    %22 = vector.extract_strided_slice %17 {offsets = [0, 96], sizes = [2, 32], strides = [1, 1]} : vector<2x128xf32> to vector<2x32xf32>
    %23 = arith.mulf %20, %10 : vector<2x32xf32>
    %24 = arith.mulf %19, %21 : vector<2x32xf32>
    %25 = arith.addf %23, %24 : vector<2x32xf32>
    %26 = math.tanh %25 : vector<2x32xf32>
    %27 = arith.mulf %22, %26 : vector<2x32xf32>
    %28 = vector.extract_strided_slice %8 {offsets = [0, 1, 0], sizes = [2, 1, 128], strides = [1, 1, 1]} : vector<2x8x128xf32> to vector<2x1x128xf32>
    %29 = vector.shape_cast %28 : vector<2x1x128xf32> to vector<2x128xf32>
    %30 = arith.truncf %27 : vector<2x32xf32> to vector<2x32xbf16>
    %cst_10 = arith.constant dense<0.000000e+00> : vector<2x128xf32>
    %31 = tpu.matmul %30, %9, %cst_10 {dimension_numbers = #tpu.dot_dimension_numbers<[1], [0], [0], [1], [0, 0, 1, 1], [], []>} : vector<2x32xbf16>, vector<32x128xbf16>, vector<2x128xf32> -> vector<2x128xf32>
    %32 = arith.addf %29, %31 : vector<2x128xf32>
    %33 = arith.negf %32 : vector<2x128xf32>
    %34 = math.exp %33 : vector<2x128xf32>
    %cst_11 = arith.constant 1.000000e+00 : f32
    %35 = vector.broadcast %cst_11 : f32 to vector<2x128xf32>
    %36 = arith.addf %35, %34 : vector<2x128xf32>
    %37 = arith.divf %35, %36 : vector<2x128xf32>
    %38 = math.tanh %32 : vector<2x128xf32>
    %39 = vector.extract_strided_slice %37 {offsets = [0, 0], sizes = [2, 32], strides = [1, 1]} : vector<2x128xf32> to vector<2x32xf32>
    %40 = vector.extract_strided_slice %37 {offsets = [0, 32], sizes = [2, 32], strides = [1, 1]} : vector<2x128xf32> to vector<2x32xf32>
    %41 = vector.extract_strided_slice %38 {offsets = [0, 64], sizes = [2, 32], strides = [1, 1]} : vector<2x128xf32> to vector<2x32xf32>
    %42 = vector.extract_strided_slice %37 {offsets = [0, 96], sizes = [2, 32], strides = [1, 1]} : vector<2x128xf32> to vector<2x32xf32>
    %43 = arith.mulf %40, %25 : vector<2x32xf32>
    %44 = arith.mulf %39, %41 : vector<2x32xf32>
    %45 = arith.addf %43, %44 : vector<2x32xf32>
    %46 = math.tanh %45 : vector<2x32xf32>
    %47 = arith.mulf %42, %46 : vector<2x32xf32>
    %48 = vector.extract_strided_slice %8 {offsets = [0, 2, 0], sizes = [2, 1, 128], strides = [1, 1, 1]} : vector<2x8x128xf32> to vector<2x1x128xf32>
    %49 = vector.shape_cast %48 : vector<2x1x128xf32> to vector<2x128xf32>
    %50 = arith.truncf %47 : vector<2x32xf32> to vector<2x32xbf16>
    %cst_12 = arith.constant dense<0.000000e+00> : vector<2x128xf32>
    %51 = tpu.matmul %50, %9, %cst_12 {dimension_numbers = #tpu.dot_dimension_numbers<[1], [0], [0], [1], [0, 0, 1, 1], [], []>} : vector<2x32xbf16>, vector<32x128xbf16>, vector<2x128xf32> -> vector<2x128xf32>
    %52 = arith.addf %49, %51 : vector<2x128xf32>
    %53 = arith.negf %52 : vector<2x128xf32>
    %54 = math.exp %53 : vector<2x128xf32>
    %cst_13 = arith.constant 1.000000e+00 : f32
    %55 = vector.broadcast %cst_13 : f32 to vector<2x128xf32>
    %56 = arith.addf %55, %54 : vector<2x128xf32>
    %57 = arith.divf %55, %56 : vector<2x128xf32>
    %58 = math.tanh %52 : vector<2x128xf32>
    %59 = vector.extract_strided_slice %57 {offsets = [0, 0], sizes = [2, 32], strides = [1, 1]} : vector<2x128xf32> to vector<2x32xf32>
    %60 = vector.extract_strided_slice %57 {offsets = [0, 32], sizes = [2, 32], strides = [1, 1]} : vector<2x128xf32> to vector<2x32xf32>
    %61 = vector.extract_strided_slice %58 {offsets = [0, 64], sizes = [2, 32], strides = [1, 1]} : vector<2x128xf32> to vector<2x32xf32>
    %62 = vector.extract_strided_slice %57 {offsets = [0, 96], sizes = [2, 32], strides = [1, 1]} : vector<2x128xf32> to vector<2x32xf32>
    %63 = arith.mulf %60, %45 : vector<2x32xf32>
    %64 = arith.mulf %59, %61 : vector<2x32xf32>
    %65 = arith.addf %63, %64 : vector<2x32xf32>
    %66 = math.tanh %65 : vector<2x32xf32>
    %67 = arith.mulf %62, %66 : vector<2x32xf32>
    %68 = vector.extract_strided_slice %8 {offsets = [0, 3, 0], sizes = [2, 1, 128], strides = [1, 1, 1]} : vector<2x8x128xf32> to vector<2x1x128xf32>
    %69 = vector.shape_cast %68 : vector<2x1x128xf32> to vector<2x128xf32>
    %70 = arith.truncf %67 : vector<2x32xf32> to vector<2x32xbf16>
    %cst_14 = arith.constant dense<0.000000e+00> : vector<2x128xf32>
    %71 = tpu.matmul %70, %9, %cst_14 {dimension_numbers = #tpu.dot_dimension_numbers<[1], [0], [0], [1], [0, 0, 1, 1], [], []>} : vector<2x32xbf16>, vector<32x128xbf16>, vector<2x128xf32> -> vector<2x128xf32>
    %72 = arith.addf %69, %71 : vector<2x128xf32>
    %73 = arith.negf %72 : vector<2x128xf32>
    %74 = math.exp %73 : vector<2x128xf32>
    %cst_15 = arith.constant 1.000000e+00 : f32
    %75 = vector.broadcast %cst_15 : f32 to vector<2x128xf32>
    %76 = arith.addf %75, %74 : vector<2x128xf32>
    %77 = arith.divf %75, %76 : vector<2x128xf32>
    %78 = math.tanh %72 : vector<2x128xf32>
    %79 = vector.extract_strided_slice %77 {offsets = [0, 0], sizes = [2, 32], strides = [1, 1]} : vector<2x128xf32> to vector<2x32xf32>
    %80 = vector.extract_strided_slice %77 {offsets = [0, 32], sizes = [2, 32], strides = [1, 1]} : vector<2x128xf32> to vector<2x32xf32>
    %81 = vector.extract_strided_slice %78 {offsets = [0, 64], sizes = [2, 32], strides = [1, 1]} : vector<2x128xf32> to vector<2x32xf32>
    %82 = vector.extract_strided_slice %77 {offsets = [0, 96], sizes = [2, 32], strides = [1, 1]} : vector<2x128xf32> to vector<2x32xf32>
    %83 = arith.mulf %80, %65 : vector<2x32xf32>
    %84 = arith.mulf %79, %81 : vector<2x32xf32>
    %85 = arith.addf %83, %84 : vector<2x32xf32>
    %86 = math.tanh %85 : vector<2x32xf32>
    %87 = arith.mulf %82, %86 : vector<2x32xf32>
    %88 = vector.extract_strided_slice %8 {offsets = [0, 4, 0], sizes = [2, 1, 128], strides = [1, 1, 1]} : vector<2x8x128xf32> to vector<2x1x128xf32>
    %89 = vector.shape_cast %88 : vector<2x1x128xf32> to vector<2x128xf32>
    %90 = arith.truncf %87 : vector<2x32xf32> to vector<2x32xbf16>
    %cst_16 = arith.constant dense<0.000000e+00> : vector<2x128xf32>
    %91 = tpu.matmul %90, %9, %cst_16 {dimension_numbers = #tpu.dot_dimension_numbers<[1], [0], [0], [1], [0, 0, 1, 1], [], []>} : vector<2x32xbf16>, vector<32x128xbf16>, vector<2x128xf32> -> vector<2x128xf32>
    %92 = arith.addf %89, %91 : vector<2x128xf32>
    %93 = arith.negf %92 : vector<2x128xf32>
    %94 = math.exp %93 : vector<2x128xf32>
    %cst_17 = arith.constant 1.000000e+00 : f32
    %95 = vector.broadcast %cst_17 : f32 to vector<2x128xf32>
    %96 = arith.addf %95, %94 : vector<2x128xf32>
    %97 = arith.divf %95, %96 : vector<2x128xf32>
    %98 = math.tanh %92 : vector<2x128xf32>
    %99 = vector.extract_strided_slice %97 {offsets = [0, 0], sizes = [2, 32], strides = [1, 1]} : vector<2x128xf32> to vector<2x32xf32>
    %100 = vector.extract_strided_slice %97 {offsets = [0, 32], sizes = [2, 32], strides = [1, 1]} : vector<2x128xf32> to vector<2x32xf32>
    %101 = vector.extract_strided_slice %98 {offsets = [0, 64], sizes = [2, 32], strides = [1, 1]} : vector<2x128xf32> to vector<2x32xf32>
    %102 = vector.extract_strided_slice %97 {offsets = [0, 96], sizes = [2, 32], strides = [1, 1]} : vector<2x128xf32> to vector<2x32xf32>
    %103 = arith.mulf %100, %85 : vector<2x32xf32>
    %104 = arith.mulf %99, %101 : vector<2x32xf32>
    %105 = arith.addf %103, %104 : vector<2x32xf32>
    %106 = math.tanh %105 : vector<2x32xf32>
    %107 = arith.mulf %102, %106 : vector<2x32xf32>
    %108 = vector.extract_strided_slice %8 {offsets = [0, 5, 0], sizes = [2, 1, 128], strides = [1, 1, 1]} : vector<2x8x128xf32> to vector<2x1x128xf32>
    %109 = vector.shape_cast %108 : vector<2x1x128xf32> to vector<2x128xf32>
    %110 = arith.truncf %107 : vector<2x32xf32> to vector<2x32xbf16>
    %cst_18 = arith.constant dense<0.000000e+00> : vector<2x128xf32>
    %111 = tpu.matmul %110, %9, %cst_18 {dimension_numbers = #tpu.dot_dimension_numbers<[1], [0], [0], [1], [0, 0, 1, 1], [], []>} : vector<2x32xbf16>, vector<32x128xbf16>, vector<2x128xf32> -> vector<2x128xf32>
    %112 = arith.addf %109, %111 : vector<2x128xf32>
    %113 = arith.negf %112 : vector<2x128xf32>
    %114 = math.exp %113 : vector<2x128xf32>
    %cst_19 = arith.constant 1.000000e+00 : f32
    %115 = vector.broadcast %cst_19 : f32 to vector<2x128xf32>
    %116 = arith.addf %115, %114 : vector<2x128xf32>
    %117 = arith.divf %115, %116 : vector<2x128xf32>
    %118 = math.tanh %112 : vector<2x128xf32>
    %119 = vector.extract_strided_slice %117 {offsets = [0, 0], sizes = [2, 32], strides = [1, 1]} : vector<2x128xf32> to vector<2x32xf32>
    %120 = vector.extract_strided_slice %117 {offsets = [0, 32], sizes = [2, 32], strides = [1, 1]} : vector<2x128xf32> to vector<2x32xf32>
    %121 = vector.extract_strided_slice %118 {offsets = [0, 64], sizes = [2, 32], strides = [1, 1]} : vector<2x128xf32> to vector<2x32xf32>
    %122 = vector.extract_strided_slice %117 {offsets = [0, 96], sizes = [2, 32], strides = [1, 1]} : vector<2x128xf32> to vector<2x32xf32>
    %123 = arith.mulf %120, %105 : vector<2x32xf32>
    %124 = arith.mulf %119, %121 : vector<2x32xf32>
    %125 = arith.addf %123, %124 : vector<2x32xf32>
    %126 = math.tanh %125 : vector<2x32xf32>
    %127 = arith.mulf %122, %126 : vector<2x32xf32>
    %128 = vector.extract_strided_slice %8 {offsets = [0, 6, 0], sizes = [2, 1, 128], strides = [1, 1, 1]} : vector<2x8x128xf32> to vector<2x1x128xf32>
    %129 = vector.shape_cast %128 : vector<2x1x128xf32> to vector<2x128xf32>
    %130 = arith.truncf %127 : vector<2x32xf32> to vector<2x32xbf16>
    %cst_20 = arith.constant dense<0.000000e+00> : vector<2x128xf32>
    %131 = tpu.matmul %130, %9, %cst_20 {dimension_numbers = #tpu.dot_dimension_numbers<[1], [0], [0], [1], [0, 0, 1, 1], [], []>} : vector<2x32xbf16>, vector<32x128xbf16>, vector<2x128xf32> -> vector<2x128xf32>
    %132 = arith.addf %129, %131 : vector<2x128xf32>
    %133 = arith.negf %132 : vector<2x128xf32>
    %134 = math.exp %133 : vector<2x128xf32>
    %cst_21 = arith.constant 1.000000e+00 : f32
    %135 = vector.broadcast %cst_21 : f32 to vector<2x128xf32>
    %136 = arith.addf %135, %134 : vector<2x128xf32>
    %137 = arith.divf %135, %136 : vector<2x128xf32>
    %138 = math.tanh %132 : vector<2x128xf32>
    %139 = vector.extract_strided_slice %137 {offsets = [0, 0], sizes = [2, 32], strides = [1, 1]} : vector<2x128xf32> to vector<2x32xf32>
    %140 = vector.extract_strided_slice %137 {offsets = [0, 32], sizes = [2, 32], strides = [1, 1]} : vector<2x128xf32> to vector<2x32xf32>
    %141 = vector.extract_strided_slice %138 {offsets = [0, 64], sizes = [2, 32], strides = [1, 1]} : vector<2x128xf32> to vector<2x32xf32>
    %142 = vector.extract_strided_slice %137 {offsets = [0, 96], sizes = [2, 32], strides = [1, 1]} : vector<2x128xf32> to vector<2x32xf32>
    %143 = arith.mulf %140, %125 : vector<2x32xf32>
    %144 = arith.mulf %139, %141 : vector<2x32xf32>
    %145 = arith.addf %143, %144 : vector<2x32xf32>
    %146 = math.tanh %145 : vector<2x32xf32>
    %147 = arith.mulf %142, %146 : vector<2x32xf32>
    %148 = vector.extract_strided_slice %8 {offsets = [0, 7, 0], sizes = [2, 1, 128], strides = [1, 1, 1]} : vector<2x8x128xf32> to vector<2x1x128xf32>
    %149 = vector.shape_cast %148 : vector<2x1x128xf32> to vector<2x128xf32>
    %150 = arith.truncf %147 : vector<2x32xf32> to vector<2x32xbf16>
    %cst_22 = arith.constant dense<0.000000e+00> : vector<2x128xf32>
    %151 = tpu.matmul %150, %9, %cst_22 {dimension_numbers = #tpu.dot_dimension_numbers<[1], [0], [0], [1], [0, 0, 1, 1], [], []>} : vector<2x32xbf16>, vector<32x128xbf16>, vector<2x128xf32> -> vector<2x128xf32>
    %152 = arith.addf %149, %151 : vector<2x128xf32>
    %153 = arith.negf %152 : vector<2x128xf32>
    %154 = math.exp %153 : vector<2x128xf32>
    %cst_23 = arith.constant 1.000000e+00 : f32
    %155 = vector.broadcast %cst_23 : f32 to vector<2x128xf32>
    %156 = arith.addf %155, %154 : vector<2x128xf32>
    %157 = arith.divf %155, %156 : vector<2x128xf32>
    %158 = math.tanh %152 : vector<2x128xf32>
    %159 = vector.extract_strided_slice %157 {offsets = [0, 0], sizes = [2, 32], strides = [1, 1]} : vector<2x128xf32> to vector<2x32xf32>
    %160 = vector.extract_strided_slice %157 {offsets = [0, 32], sizes = [2, 32], strides = [1, 1]} : vector<2x128xf32> to vector<2x32xf32>
    %161 = vector.extract_strided_slice %158 {offsets = [0, 64], sizes = [2, 32], strides = [1, 1]} : vector<2x128xf32> to vector<2x32xf32>
    %162 = vector.extract_strided_slice %157 {offsets = [0, 96], sizes = [2, 32], strides = [1, 1]} : vector<2x128xf32> to vector<2x32xf32>
    %163 = arith.mulf %160, %145 : vector<2x32xf32>
    %164 = arith.mulf %159, %161 : vector<2x32xf32>
    %165 = arith.addf %163, %164 : vector<2x32xf32>
    %166 = math.tanh %165 : vector<2x32xf32>
    %167 = arith.mulf %162, %166 : vector<2x32xf32>
    %168 = tpu.concatenate %27, %47, %67, %87, %107, %127, %147, %167 in 1 : vector<2x32xf32>, vector<2x32xf32>, vector<2x32xf32>, vector<2x32xf32>, vector<2x32xf32>, vector<2x32xf32>, vector<2x32xf32>, vector<2x32xf32> -> vector<2x256xf32>
    %c0_24 = arith.constant 0 : index
    %c0_25 = arith.constant 0 : index
    %169 = vector.load %arg4[%c0_24, %c0_25] : memref<2x256xf32, #tpu.memory_space<vmem>>, vector<2x256xf32>
    tpu.vector_store %arg4[%c0_24, %c0_25], %168 {strides = array<i32>} : memref<2x256xf32, #tpu.memory_space<vmem>>, vector<2x256xf32>,
    %c0_26 = arith.constant 0 : index
    %c0_27 = arith.constant 0 : index
    %170 = vector.load %arg5[%c0_26, %c0_27] : memref<2x32xf32, #tpu.memory_space<vmem>>, vector<2x32xf32>
    tpu.vector_store %arg5[%c0_26, %c0_27], %167 {strides = array<i32>} : memref<2x32xf32, #tpu.memory_space<vmem>>, vector<2x32xf32>,
    return
  }
}

</mosaic_0001>

<bundles_post_ra>
// kernel: tpu_custom_call.1
= control target key start
LH: loop header
LB: loop body
LE: loop exit
PB: predicated region body
PF: predicated region fallthrough
CT: control target
= control target key end

     0   :  { %11 = vsyncpa [#allocation3], 0  ;;  %vm34_vm0 = vcmask 1041408   ;;  %vm35_vm1 = vcmask 1042432   ;;  %v1285_v1 = vmov 65535   ;;  %s1531_s0 = inlined_call_operand.vmem [shape: f32[2,8,5], index: 0, kind: input, shape index: {}]   ;;  %s1532_s1 = inlined_call_operand.vmem [shape: bf16[5,128], index: 1, kind: input, shape index: {}]   ;;  %s1533_s2 = inlined_call_operand.vmem [shape: bf16[32,128], index: 2, kind: input, shape index: {}]   ;;  %s1534_s3 = inlined_call_operand.vmem [shape: f32[1,128], index: 3, kind: input, shape index: {}]   ;;  %s1535_s4 = inlined_call_operand.hbm [shape: f32[2,256], index: 4, kind: output, shape index: {0}]   ;;  %s1536_s5 = inlined_call_operand.hbm [shape: f32[2,32], index: 5, kind: output, shape index: {1}]  }
   0x1   :  { %v25_v0 = vld [vmem:[%s1532_s1] sm:$0x7]  ;;  %v36_v2 = vsel %vm34_vm0, 4294967295, %v1285_v1  ;;  %v23_v4 = vld [vmem:[%s1531_s0 + $0x8] sm:$0xff] }
   0x2   :  { %v22_v3 = vld [vmem:[%s1531_s0] sm:$0xff]  ;;  %v37_v5 = vsel %vm35_vm1, %v36_v2, 0 }
   0x3   :  { %12 = vsyncpa [#allocation5], 0  ;;  %v39_v6 = vand.u32 %v37_v5, %v25_v0  ;;  %v24_v7 = vpack.c.bf16 %v23_v4, %v22_v3  ;;  %vm30_vm2 = vcmask 39936   ;;  %v1104_v9 = vld [vmem:[%s1534_s3] ss:$0 sm:$0xff]  ;;  %s1286_s0 = smov 64  }
   0x4   :  { %s1287_s3 = smov 32   ;;  %v1097_v53 = vld [vmem:[%s1533_s2 + $0x8] sm:$0xff]  ;;  %v1096_v54 = vld [vmem:[%s1533_s2] sm:$0xff]  ;;  %vm140_vm11 = vcmask 1041409   ;;  %vm157_vm12 = vcmask 261120   ;;  %s1288_s2 = smov 96  }
   0x5   :  { %48 = vmatpush.bf16.msra.mxu0 %v39_v6  ;;  %167 = vmatpush.bf16.msra.mxu1 %v1097_v53  ;;  %s1289_s29 = smov [#allocation2]   ;;  %s1039_s8 = sshll.u32 %s1535_s4, 4  ;;  %s1040_s8 = int_to_ptr.hbm [resolvable:$true] %s1039_s8 }
   0x6   :  { %280 = vmatpush.bf16.msra.mxu2 %v1097_v53  ;;  %395 = vmatpush.bf16.msra.mxu3 %v1097_v53  ;;  %s1037_s30 = sshll.u32 %s1289_s29, 4  ;;  %s1290_s9 = smov [#allocation4]   ;;  %s1038_s30 = int_to_ptr.vmem [resolvable:$true] %s1037_s30 }
   0x7   :  { %s1048_s10 = sshll.u32 %s1290_s9, 4  ;;  %s1050_s4 = sshll.u32 %s1536_s5, 4  ;;  %s1049_s10 = int_to_ptr.vmem [resolvable:$true] %s1048_s10  ;;  %s1051_s4 = int_to_ptr.hbm [resolvable:$true] %s1050_s4 }
   0x8   :  { %1064 = vmatmul.msk.bf16.vlgmr.msra.gmra.mxu0 %vm30_vm2, %v24_v7 }
   0x9   :  { %510 = vmatpush.bf16.msrb.mxu0 %v1097_v53  ;;  %168 = vmatpush.bf16.msra.mxu1 %v1096_v54 }
   0xa   :  { %281 = vmatpush.bf16.msra.mxu2 %v1096_v54  ;;  %396 = vmatpush.bf16.msra.mxu3 %v1096_v54 }
   0xd   :  { %511 = vmatpush.bf16.msrb.mxu0 %v1096_v54  ;;  %625 = vmatpush.bf16.msrb.mxu1 %v1097_v53 }
   0xe   :  { %740 = vmatpush.bf16.msrb.mxu2 %v1097_v53  ;;  %855 = vmatpush.bf16.msrb.mxu3 %v1097_v53 }
  0x11   :  { %626 = vmatpush.bf16.msrb.mxu1 %v1096_v54 }
  0x12   :  { %741 = vmatpush.bf16.msrb.mxu2 %v1096_v54  ;;  %856 = vmatpush.bf16.msrb.mxu3 %v1096_v54 }
  0x85   :  { %v50_v8 = vpop.f32.mrf.mxu0 }
  0x86   :  { %v1337_v12 = vadd.f32 %v1104_v9, %v50_v8 }
  0x88   :  { %v1065_v16 = vmul.f32 -1.442695, %v1337_v12 }
  0x8d   :  { %v52_v10 = vpop.f32.mrf.mxu0 }
  0x8e   :  { %v1334_v11 = vadd.f32 %v1104_v9, %v52_v10 }
  0x90   :  { %1105 = vtanh.f32 %v1334_v11  ;;  %v1066_v15 = vmul.f32 -1.442695, %v1334_v11 }
  0x91   :  { %1107 = vtanh.f32 %v1337_v12 }
  0x92   :  { %1109 = vpow2.f32 %v1066_v15 }
  0x93   :  { %1111 = vpow2.f32 %v1065_v16 }
  0x96   :  { %v1106_v13 = vpop.eup %1105 }
  0x97   :  { %105 = vrot.lane.b32.xlu0 %v1106_v13, %s1286_s0  ;;  %v1108_v14 = vpop.eup %1107 }
  0x98   :  { %v1110_v17 = vpop.eup %1109 }
  0x99   :  { %v66_v18 = vadd.f32 1.0, %v1110_v17  ;;  %v1112_v19 = vpop.eup %1111 }
  0x9a   :  { %v65_v20 = vadd.f32 1.0, %v1112_v19 }
  0x9b   :  { %1113 = vrcp.f32 %v66_v18  ;;  %v93_v29 = vand.u32 2147483648, %v66_v18  ;;  %vm87_vm4 = vweird.f32 %v66_v18  ;;  %v91_v30 = vand.u32 2147483647, %v66_v18 }
  0x9c   :  { %1115 = vrcp.f32 %v65_v20  ;;  %v78_v38 = vand.u32 2147483648, %v65_v20  ;;  %vm72_vm8 = vweird.f32 %v65_v20  ;;  %v76_v39 = vand.u32 2147483647, %v65_v20 }
  0x9d   :  { %v94_v33 = vor.u32 1.1754944e-38, %v93_v29  ;;  %vm92_vm6 = vcmp.eq.f32.partialorder %v91_v30, 8.507059e+37 }
  0x9e   :  { %v79_v41 = vor.u32 1.1754944e-38, %v78_v38  ;;  %vm77_vm10 = vcmp.eq.f32.partialorder %v76_v39, 8.507059e+37 }
  0x9f   :  { %103 = vrot.lane.b32.xlu0 %v1108_v14, %s1286_s0 }
  0xa1   :  { %v1114_v21 = vpop.eup %1113 }
  0xa2   :  { %v83_v22 = vmul.f32 %v1114_v21, %v66_v18  ;;  %v1116_v24 = vpop.eup %1115  ;;  %vm88_vm3 = vweird.f32 %v1114_v21 }
  0xa3   :  { %v68_v26 = vmul.f32 %v1116_v24, %v65_v20  ;;  %vm89_vm5 = vmor %vm87_vm4, %vm88_vm3  ;;  %vm73_vm7 = vweird.f32 %v1116_v24 }
  0xa4   :  { %v84_v23 = vsub.f32 1.0, %v83_v22  ;;  %vm74_vm9 = vmor %vm72_vm8, %vm73_vm7 }
  0xa5   :  { %v69_v28 = vsub.f32 1.0, %v68_v26 }
  0xa6   :  { %v85_v25 = vmul.f32 %v1114_v21, %v84_v23 }
  0xa7   :  { %v70_v32 = vmul.f32 %v1116_v24, %v69_v28 }
  0xa8   :  { %v86_v27 = vadd.f32 %v1114_v21, %v85_v25 }
  0xa9   :  { %v71_v37 = vadd.f32 %v1116_v24, %v70_v32 }
  0xaa   :  { %v90_v31 = vsel %vm89_vm5, %v1114_v21, %v86_v27 }
  0xab   :  { %v95_v35 = vsel %vm92_vm6, %v94_v33, %v90_v31  ;;  %v75_v40 = vsel %vm74_vm9, %v1116_v24, %v71_v37 }
  0xac   :  { %v80_v43 = vsel %vm77_vm10, %v79_v41, %v75_v40  ;;  %v100_v45 = vmul.f32 0.0, %v95_v35 }
  0xad   :  { %v99_v48 = vmul.f32 0.0, %v80_v43 }
 0x109   :  { %v106_v34 = vpop.permute.xlu0 %105 }
 0x10a   :  { %v110_v36 = vmul.f32 %v106_v34, %v95_v35 }
 0x10c   :  { %115 = vrot.lane.b32.xlu1 %v110_v36, %s1287_s3 }
 0x111   :  { %v104_v42 = vpop.permute.xlu0 %103 }
 0x112   :  { %v109_v44 = vmul.f32 %v104_v42, %v80_v43 }
 0x114   :  { %113 = vrot.lane.b32.xlu1 %v109_v44, %s1287_s3 }
 0x17e   :  { %v116_v46 = vpop.permute.xlu1 %115 }
 0x17f   :  { %v1346_v47 = vadd.f32 %v116_v46, %v100_v45 }
 0x181   :  { %1117 = vtanh.f32 %v1346_v47  ;;  %v223_v44 = vrot.slane %v1346_v47, 7 }
 0x186   :  { %v114_v49 = vpop.permute.xlu1 %113 }
 0x187   :  { %v1118_v50 = vpop.eup %1117  ;;  %v1349_v51 = vadd.f32 %v114_v49, %v99_v48 }
 0x188   :  { %127 = vrot.lane.b32.xlu2 %v1118_v50, %s1286_s0 }
 0x189   :  { %1119 = vtanh.f32 %v1349_v51  ;;  %v222_v50 = vrot.slane %v1349_v51, 7 }
 0x18f   :  { %v1120_v52 = vpop.eup %1119 }
 0x190   :  { %125 = vrot.lane.b32.xlu2 %v1120_v52, %s1286_s0 }
 0x1e2   :  { %v128_v55 = vpop.permute.xlu2 %127 }
 0x1e3   :  { %v132_v56 = vmul.f32 %v128_v55, %v95_v35 }
 0x1e5   :  { %v134_v57 = vpack.c.bf16 %v132_v56, %v132_v56  ;;  %v951_v60 = vrot.slane %v132_v56, 7 }
 0x1e7   :  { %v138_v59 = vunpack.c.l.b16 %v134_v57 }
 0x1e9   :  { %v139_v0 = vrot.slane %v138_v59, 7 }
 0x1ea   :  { %v126_v58 = vpop.permute.xlu2 %125 }
 0x1eb   :  { %v131_v61 = vmul.f32 %v126_v58, %v80_v43 }
 0x1ed   :  { %v133_v62 = vpack.c.bf16 %v131_v61, %v131_v61  ;;  %v1361_v63 = vsel %vm140_vm11, %v951_v60, %v131_v61 }
 0x1ef   :  { %v137_v1 = vunpack.c.l.b16 %v133_v62 }
 0x1f1   :  { %v141_v2 = vsel %vm140_vm11, %v139_v0, %v137_v1 }
 0x1f2   :  { %v142_v3 = vpack.c.b16 %v141_v2, %v141_v2 }
 0x1f4   :  { %143 = vrot.lane.b32.xlu0 %v142_v3, %s1287_s3 }
 0x266   :  { %v144_v4 = vpop.permute.xlu0 %143 }
 0x267   :  { %1075 = vmatmul.msk.bf16.vlgmr.msra.gmra.mxu1 %vm157_vm12, %v144_v4 }
 0x2e4   :  { %v170_v5 = vpop.f32.mrf.mxu1 }
 0x2e5   :  { %v175_v6 = vrot.slane %v170_v5, 7  ;;  %v179_v7 = vadd.f32 %v170_v5, %v1334_v11 }
 0x2e7   :  { %v178_v8 = vadd.f32 %v175_v6, %v1337_v12  ;;  %1121 = vtanh.f32 %v179_v7  ;;  %v1077_v14 = vmul.f32 -1.442695, %v179_v7 }
 0x2e9   :  { %1123 = vtanh.f32 %v178_v8  ;;  %v1076_v19 = vmul.f32 -1.442695, %v178_v8 }
 0x2ea   :  { %1125 = vpow2.f32 %v1077_v14 }
 0x2ec   :  { %v172_v9 = vpop.f32.mrf.mxu1 }
 0x2ed   :  { %v1122_v10 = vpop.eup %1121 }
 0x2ee   :  { %232 = vrot.lane.b32.xlu2 %v1122_v10, %s1286_s0 }
 0x2ef   :  { %v1124_v13 = vpop.eup %1123 }
 0x2f0   :  { %230 = vrot.lane.b32.xlu1 %v1124_v13, %s1286_s0  ;;  %v1126_v15 = vpop.eup %1125 }
 0x2f1   :  { %v187_v16 = vadd.f32 1.0, %v1126_v15 }
 0x2f3   :  { %1127 = vrcp.f32 %v187_v16  ;;  %v214_v24 = vand.u32 2147483648, %v187_v16  ;;  %vm208_vm14 = vweird.f32 %v187_v16  ;;  %v212_v26 = vand.u32 2147483647, %v187_v16 }
 0x2f4   :  { %1129 = vpow2.f32 %v1076_v19 }
 0x2f5   :  { %v215_v28 = vor.u32 1.1754944e-38, %v214_v24  ;;  %vm213_vm1 = vcmp.eq.f32.partialorder %v212_v26, 8.507059e+37 }
 0x2f9   :  { %v1128_v17 = vpop.eup %1127 }
 0x2fa   :  { %v204_v18 = vmul.f32 %v1128_v17, %v187_v16  ;;  %v1130_v22 = vpop.eup %1129  ;;  %vm209_vm13 = vweird.f32 %v1128_v17 }
 0x2fb   :  { %v186_v25 = vadd.f32 1.0, %v1130_v22  ;;  %vm210_vm15 = vmor %vm208_vm14, %vm209_vm13 }
 0x2fc   :  { %v205_v20 = vsub.f32 1.0, %v204_v18 }
 0x2fd   :  { %1131 = vrcp.f32 %v186_v25  ;;  %v199_v37 = vand.u32 2147483648, %v186_v25  ;;  %vm193_vm3 = vweird.f32 %v186_v25  ;;  %v197_v38 = vand.u32 2147483647, %v186_v25 }
 0x2fe   :  { %v206_v21 = vmul.f32 %v1128_v17, %v205_v20 }
 0x2ff   :  { %v200_v40 = vor.u32 1.1754944e-38, %v199_v37  ;;  %vm198_vm5 = vcmp.eq.f32.partialorder %v197_v38, 8.507059e+37 }
 0x300   :  { %v207_v23 = vadd.f32 %v1128_v17, %v206_v21 }
 0x302   :  { %v211_v27 = vsel %vm210_vm15, %v1128_v17, %v207_v23 }
 0x303   :  { %v216_v30 = vsel %vm213_vm1, %v215_v28, %v211_v27  ;;  %v1132_v32 = vpop.eup %1131 }
 0x304   :  { %v189_v33 = vmul.f32 %v1132_v32, %v186_v25  ;;  %vm194_vm2 = vweird.f32 %v1132_v32  ;;  %v227_v45 = vmul.f32 %v223_v44, %v216_v30 }
 0x305   :  { %vm195_vm4 = vmor %vm193_vm3, %vm194_vm2 }
 0x306   :  { %v190_v34 = vsub.f32 1.0, %v189_v33 }
 0x308   :  { %v191_v35 = vmul.f32 %v1132_v32, %v190_v34 }
 0x30a   :  { %v192_v36 = vadd.f32 %v1132_v32, %v191_v35 }
 0x30c   :  { %v196_v39 = vsel %vm195_vm4, %v1132_v32, %v192_v36 }
 0x30d   :  { %v201_v42 = vsel %vm198_vm5, %v200_v40, %v196_v39 }
 0x30e   :  { %v226_v52 = vmul.f32 %v222_v50, %v201_v42 }
 0x348   :  { %v233_v29 = vpop.permute.xlu2 %232 }
 0x349   :  { %v237_v31 = vmul.f32 %v233_v29, %v216_v30 }
 0x34b   :  { %242 = vrot.lane.b32.xlu1 %v237_v31, %s1287_s3 }
 0x362   :  { %v231_v41 = vpop.permute.xlu1 %230 }
 0x363   :  { %v236_v43 = vmul.f32 %v231_v41, %v201_v42 }
 0x365   :  { %240 = vrot.lane.b32.xlu0 %v236_v43, %s1287_s3 }
 0x3bd   :  { %v243_v46 = vpop.permute.xlu1 %242 }
 0x3be   :  { %v1373_v48 = vadd.f32 %v243_v46, %v227_v45 }
 0x3c0   :  { %1133 = vtanh.f32 %v1373_v48  ;;  %v337_v46 = vrot.slane %v1373_v48, 7 }
 0x3c6   :  { %v1134_v49 = vpop.eup %1133 }
 0x3c7   :  { %254 = vrot.lane.b32.xlu0 %v1134_v49, %s1286_s0 }
 0x3d7   :  { %v241_v53 = vpop.permute.xlu0 %240 }
 0x3d8   :  { %v1378_v54 = vadd.f32 %v241_v53, %v226_v52 }
 0x3da   :  { %1135 = vtanh.f32 %v1378_v54  ;;  %v336_v45 = vrot.slane %v1378_v54, 7 }
 0x3e0   :  { %v1136_v55 = vpop.eup %1135 }
 0x3e1   :  { %252 = vrot.lane.b32.xlu2 %v1136_v55, %s1286_s0 }
 0x439   :  { %v255_v47 = vpop.permute.xlu0 %254 }
 0x43a   :  { %v259_v56 = vmul.f32 %v255_v47, %v216_v30 }
 0x43b   :  { %v253_v57 = vpop.permute.xlu2 %252 }
 0x43c   :  { %v258_v58 = vmul.f32 %v253_v57, %v201_v42  ;;  %v261_v59 = vpack.c.bf16 %v259_v56, %v259_v56 }
 0x43e   :  { %v260_v60 = vpack.c.bf16 %v258_v58, %v258_v58  ;;  %v958_v61 = vrot.slane %v258_v58, 1  ;;  %v265_v51 = vunpack.c.l.b16 %v261_v59 }
 0x440   :  { %v264_v62 = vunpack.c.l.b16 %v260_v60  ;;  %v1383_v0 = vsel %vm140_vm11, %v259_v56, %v958_v61 }
 0x442   :  { %v266_v1 = vrot.slane %v264_v62, 1 }
 0x444   :  { %v267_v2 = vsel %vm140_vm11, %v265_v51, %v266_v1 }
 0x445   :  { %v268_v3 = vpack.c.b16 %v267_v2, %v267_v2 }
 0x447   :  { %269 = vrot.lane.b32.xlu1 %v268_v3, %s1287_s3 }
 0x4b9   :  { %v270_v4 = vpop.permute.xlu1 %269 }
 0x4ba   :  { %1078 = vmatmul.msk.bf16.vlgmr.msra.gmra.mxu2 %vm157_vm12, %v270_v4 }
 0x53d   :  { %v283_v5 = vpop.f32.mrf.mxu2 }
 0x53e   :  { %v288_v6 = vrot.slane %v283_v5, 6  ;;  %v289_v7 = vrot.slane %v283_v5, 7 }
 0x540   :  { %v292_v8 = vadd.f32 %v288_v6, %v1337_v12  ;;  %v293_v9 = vadd.f32 %v289_v7, %v1334_v11 }
 0x542   :  { %1137 = vtanh.f32 %v292_v8  ;;  %v1079_v15 = vmul.f32 -1.442695, %v292_v8  ;;  %v1080_v19 = vmul.f32 -1.442695, %v293_v9 }
 0x543   :  { %1139 = vtanh.f32 %v293_v9 }
 0x544   :  { %1141 = vpow2.f32 %v1079_v15 }
 0x545   :  { %v285_v10 = vpop.f32.mrf.mxu2 }
 0x548   :  { %v1138_v13 = vpop.eup %1137 }
 0x549   :  { %v1140_v14 = vpop.eup %1139  ;;  %344 = vrot.lane.b32.xlu2 %v1138_v13, %s1286_s0 }
 0x54a   :  { %346 = vrot.lane.b32.xlu0 %v1140_v14, %s1286_s0  ;;  %v1142_v16 = vpop.eup %1141 }
 0x54b   :  { %v300_v17 = vadd.f32 1.0, %v1142_v16 }
 0x54d   :  { %1143 = vrcp.f32 %v300_v17  ;;  %v313_v26 = vand.u32 2147483648, %v300_v17  ;;  %vm307_vm7 = vweird.f32 %v300_v17  ;;  %v311_v27 = vand.u32 2147483647, %v300_v17 }
 0x54e   :  { %1145 = vpow2.f32 %v1080_v19 }
 0x54f   :  { %v314_v29 = vor.u32 1.1754944e-38, %v313_v26  ;;  %vm312_vm9 = vcmp.eq.f32.partialorder %v311_v27, 8.507059e+37 }
 0x553   :  { %v1144_v18 = vpop.eup %1143 }
 0x554   :  { %v303_v20 = vmul.f32 %v1144_v18, %v300_v17  ;;  %v1146_v23 = vpop.eup %1145  ;;  %vm308_vm6 = vweird.f32 %v1144_v18 }
 0x555   :  { %v301_v24 = vadd.f32 1.0, %v1146_v23  ;;  %vm309_vm8 = vmor %vm307_vm7, %vm308_vm6 }
 0x556   :  { %v304_v21 = vsub.f32 1.0, %v303_v20 }
 0x557   :  { %1147 = vrcp.f32 %v301_v24  ;;  %v328_v38 = vand.u32 2147483648, %v301_v24  ;;  %vm322_vm13 = vweird.f32 %v301_v24  ;;  %v326_v39 = vand.u32 2147483647, %v301_v24 }
 0x558   :  { %v305_v22 = vmul.f32 %v1144_v18, %v304_v21 }
 0x559   :  { %v329_v41 = vor.u32 1.1754944e-38, %v328_v38  ;;  %vm327_vm15 = vcmp.eq.f32.partialorder %v326_v39, 8.507059e+37 }
 0x55a   :  { %v306_v25 = vadd.f32 %v1144_v18, %v305_v22 }
 0x55c   :  { %v310_v28 = vsel %vm309_vm8, %v1144_v18, %v306_v25 }
 0x55d   :  { %v315_v31 = vsel %vm312_vm9, %v314_v29, %v310_v28  ;;  %v1148_v33 = vpop.eup %1147 }
 0x55e   :  { %v318_v34 = vmul.f32 %v1148_v33, %v301_v24  ;;  %vm323_vm10 = vweird.f32 %v1148_v33  ;;  %v340_v49 = vmul.f32 %v336_v45, %v315_v31 }
 0x55f   :  { %vm324_vm14 = vmor %vm322_vm13, %vm323_vm10 }
 0x560   :  { %v319_v35 = vsub.f32 1.0, %v318_v34 }
 0x562   :  { %v320_v36 = vmul.f32 %v1148_v33, %v319_v35 }
 0x564   :  { %v321_v37 = vadd.f32 %v1148_v33, %v320_v36 }
 0x566   :  { %v325_v40 = vsel %vm324_vm14, %v1148_v33, %v321_v37 }
 0x567   :  { %v330_v43 = vsel %vm327_vm15, %v329_v41, %v325_v40 }
 0x568   :  { %v341_v50 = vmul.f32 %v337_v46, %v330_v43 }
 0x5a3   :  { %v345_v30 = vpop.permute.xlu2 %344 }
 0x5a4   :  { %v350_v32 = vmul.f32 %v345_v30, %v315_v31 }
 0x5a6   :  { %354 = vrot.lane.b32.xlu1 %v350_v32, %s1287_s3 }
 0x5bc   :  { %v347_v42 = vpop.permute.xlu0 %346 }
 0x5bd   :  { %v351_v44 = vmul.f32 %v347_v42, %v330_v43 }
 0x5bf   :  { %356 = vrot.lane.b32.xlu2 %v351_v44, %s1287_s3 }
 0x618   :  { %v355_v52 = vpop.permute.xlu1 %354 }
 0x619   :  { %v357_v53 = vpop.permute.xlu2 %356  ;;  %v1396_v55 = vadd.f32 %v355_v52, %v340_v49 }
 0x61a   :  { %v1398_v47 = vadd.f32 %v357_v53, %v341_v50 }
 0x61b   :  { %1149 = vtanh.f32 %v1396_v55  ;;  %v451_v52 = vrot.slane %v1396_v55, 7 }
 0x61c   :  { %1151 = vtanh.f32 %v1398_v47 }
 0x621   :  { %v1150_v56 = vpop.eup %1149 }
 0x622   :  { %v1152_v57 = vpop.eup %1151  ;;  %366 = vrot.lane.b32.xlu0 %v1150_v56, %s1286_s0 }
 0x623   :  { %368 = vrot.lane.b32.xlu1 %v1152_v57, %s1286_s0 }
 0x694   :  { %v367_v54 = vpop.permute.xlu0 %366 }
 0x695   :  { %v369_v48 = vpop.permute.xlu1 %368  ;;  %v372_v58 = vmul.f32 %v367_v54, %v315_v31 }
 0x696   :  { %v373_v59 = vmul.f32 %v369_v48, %v330_v43  ;;  %v452_v48 = vrot.slane %v1398_v47, 7 }
 0x697   :  { %v374_v60 = vpack.c.bf16 %v372_v58, %v372_v58  ;;  %v965_v61 = vrot.slane %v372_v58, 2 }
 0x698   :  { %v375_v62 = vpack.c.bf16 %v373_v59, %v373_v59  ;;  %v966_v51 = vrot.slane %v373_v59, 1 }
 0x699   :  { %v378_v1 = vunpack.c.l.b16 %v374_v60 }
 0x69a   :  { %v379_v2 = vunpack.c.l.b16 %v375_v62  ;;  %v1405_v3 = vsel %vm140_vm11, %v966_v51, %v965_v61 }
 0x69b   :  { %v380_v4 = vrot.slane %v378_v1, 2 }
 0x69c   :  { %v381_v5 = vrot.slane %v379_v2, 1 }
 0x69e   :  { %v382_v6 = vsel %vm140_vm11, %v381_v5, %v380_v4 }
 0x69f   :  { %v383_v7 = vpack.c.b16 %v382_v6, %v382_v6 }
 0x6a1   :  { %384 = vrot.lane.b32.xlu2 %v383_v7, %s1287_s3 }
 0x6fb   :  { %v385_v8 = vpop.permute.xlu2 %384 }
 0x6fc   :  { %1081 = vmatmul.msk.bf16.vlgmr.msra.gmra.mxu3 %vm157_vm12, %v385_v8 }
 0x77f   :  { %v398_v9 = vpop.f32.mrf.mxu3 }
 0x780   :  { %v403_v10 = vrot.slane %v398_v9, 5  ;;  %v404_v13 = vrot.slane %v398_v9, 6 }
 0x782   :  { %v407_v14 = vadd.f32 %v403_v10, %v1337_v12  ;;  %v408_v15 = vadd.f32 %v404_v13, %v1334_v11 }
 0x784   :  { %1153 = vtanh.f32 %v407_v14  ;;  %v1082_v19 = vmul.f32 -1.442695, %v407_v14  ;;  %v1083_v20 = vmul.f32 -1.442695, %v408_v15 }
 0x785   :  { %1155 = vtanh.f32 %v408_v15 }
 0x786   :  { %1157 = vpow2.f32 %v1082_v19 }
 0x787   :  { %v400_v16 = vpop.f32.mrf.mxu3  ;;  %1159 = vpow2.f32 %v1083_v20 }
 0x78a   :  { %v1154_v17 = vpop.eup %1153 }
 0x78b   :  { %v1156_v18 = vpop.eup %1155  ;;  %459 = vrot.lane.b32.xlu0 %v1154_v17, %s1286_s0 }
 0x78c   :  { %461 = vrot.lane.b32.xlu1 %v1156_v18, %s1286_s0  ;;  %v1158_v21 = vpop.eup %1157 }
 0x78d   :  { %v1160_v22 = vpop.eup %1159  ;;  %v415_v23 = vadd.f32 1.0, %v1158_v21 }
 0x78e   :  { %v416_v24 = vadd.f32 1.0, %v1160_v22 }
 0x78f   :  { %1161 = vrcp.f32 %v415_v23  ;;  %v428_v35 = vand.u32 2147483648, %v415_v23  ;;  %vm422_vm3 = vweird.f32 %v415_v23  ;;  %v426_v37 = vand.u32 2147483647, %v415_v23 }
 0x790   :  { %1163 = vrcp.f32 %v416_v24  ;;  %v443_v36 = vand.u32 2147483648, %v416_v24  ;;  %vm437_vm4 = vweird.f32 %v416_v24  ;;  %v441_v38 = vand.u32 2147483647, %v416_v24 }
 0x791   :  { %v429_v41 = vor.u32 1.1754944e-38, %v428_v35  ;;  %vm427_vm7 = vcmp.eq.f32.partialorder %v426_v37, 8.507059e+37 }
 0x792   :  { %v444_v42 = vor.u32 1.1754944e-38, %v443_v36  ;;  %vm442_vm8 = vcmp.eq.f32.partialorder %v441_v38, 8.507059e+37 }
 0x795   :  { %v1162_v25 = vpop.eup %1161 }
 0x796   :  { %v1164_v26 = vpop.eup %1163  ;;  %v418_v27 = vmul.f32 %v1162_v25, %v415_v23  ;;  %vm423_vm1 = vweird.f32 %v1162_v25 }
 0x797   :  { %v433_v28 = vmul.f32 %v1164_v26, %v416_v24  ;;  %vm438_vm2 = vweird.f32 %v1164_v26  ;;  %vm424_vm5 = vmor %vm422_vm3, %vm423_vm1 }
 0x798   :  { %v419_v29 = vsub.f32 1.0, %v418_v27  ;;  %vm439_vm6 = vmor %vm437_vm4, %vm438_vm2 }
 0x799   :  { %v434_v30 = vsub.f32 1.0, %v433_v28 }
 0x79a   :  { %v420_v31 = vmul.f32 %v1162_v25, %v419_v29 }
 0x79b   :  { %v435_v32 = vmul.f32 %v1164_v26, %v434_v30 }
 0x79c   :  { %v421_v33 = vadd.f32 %v1162_v25, %v420_v31 }
 0x79d   :  { %v436_v34 = vadd.f32 %v1164_v26, %v435_v32 }
 0x79e   :  { %v425_v39 = vsel %vm424_vm5, %v1162_v25, %v421_v33 }
 0x79f   :  { %v440_v40 = vsel %vm439_vm6, %v1164_v26, %v436_v34  ;;  %v430_v44 = vsel %vm427_vm7, %v429_v41, %v425_v39 }
 0x7a0   :  { %v445_v46 = vsel %vm442_vm8, %v444_v42, %v440_v40  ;;  %v455_v53 = vmul.f32 %v451_v52, %v430_v44 }
 0x7a1   :  { %v456_v58 = vmul.f32 %v452_v48, %v445_v46 }
 0x7fd   :  { %v460_v43 = vpop.permute.xlu0 %459 }
 0x7fe   :  { %v462_v45 = vpop.permute.xlu1 %461  ;;  %v465_v49 = vmul.f32 %v460_v43, %v430_v44 }
 0x7ff   :  { %v466_v50 = vmul.f32 %v462_v45, %v445_v46 }
 0x800   :  { %469 = vrot.lane.b32.xlu2 %v465_v49, %s1287_s3 }
 0x801   :  { %471 = vrot.lane.b32.xlu0 %v466_v50, %s1287_s3 }
 0x85a   :  { %v470_v56 = vpop.permute.xlu2 %469 }
 0x85b   :  { %v1417_v57 = vadd.f32 %v470_v56, %v455_v53 }
 0x85d   :  { %1165 = vtanh.f32 %v1417_v57 }
 0x863   :  { %v1166_v54 = vpop.eup %1165 }
 0x864   :  { %481 = vrot.lane.b32.xlu1 %v1166_v54, %s1286_s0 }
 0x873   :  { %v472_v59 = vpop.permute.xlu0 %471 }
 0x874   :  { %v1422_v60 = vadd.f32 %v472_v59, %v456_v58 }
 0x876   :  { %1167 = vtanh.f32 %v1422_v60  ;;  %v567_v58 = vrot.slane %v1422_v60, 7 }
 0x87c   :  { %v1168_v61 = vpop.eup %1167 }
 0x87d   :  { %483 = vrot.lane.b32.xlu2 %v1168_v61, %s1286_s0 }
 0x8d6   :  { %v482_v55 = vpop.permute.xlu1 %481 }
 0x8d7   :  { %v484_v62 = vpop.permute.xlu2 %483  ;;  %v487_v51 = vmul.f32 %v482_v55, %v430_v44 }
 0x8d8   :  { %v488_v1 = vmul.f32 %v484_v62, %v445_v46 }
 0x8d9   :  { %v489_v2 = vpack.c.bf16 %v487_v51, %v487_v51  ;;  %v973_v4 = vrot.slane %v487_v51, 3  ;;  %v566_v51 = vrot.slane %v1417_v57, 7 }
 0x8da   :  { %v490_v5 = vpack.c.bf16 %v488_v1, %v488_v1  ;;  %v974_v6 = vrot.slane %v488_v1, 2 }
 0x8db   :  { %v493_v7 = vunpack.c.l.b16 %v489_v2 }
 0x8dc   :  { %v494_v8 = vunpack.c.l.b16 %v490_v5  ;;  %v1427_v47 = vsel %vm140_vm11, %v974_v6, %v973_v4 }
 0x8dd   :  { %v495_v9 = vrot.slane %v493_v7, 3 }
 0x8de   :  { %v496_v10 = vrot.slane %v494_v8, 2 }
 0x8e0   :  { %v497_v13 = vsel %vm140_vm11, %v496_v10, %v495_v9 }
 0x8e1   :  { %v498_v14 = vpack.c.b16 %v497_v13, %v497_v13 }
 0x8e3   :  { %499 = vrot.lane.b32.xlu0 %v498_v14, %s1287_s3 }
 0x955   :  { %v500_v15 = vpop.permute.xlu0 %499 }
 0x956   :  { %1084 = vmatmul.msk.bf16.vlgmr.msrb.gmra.mxu0 %vm157_vm12, %v500_v15 }
 0x9d3   :  { %v513_v16 = vpop.f32.mrf.mxu0 }
 0x9d4   :  { %v518_v17 = vrot.slane %v513_v16, 4  ;;  %v519_v18 = vrot.slane %v513_v16, 5 }
 0x9d6   :  { %v522_v19 = vadd.f32 %v518_v17, %v1337_v12  ;;  %v523_v20 = vadd.f32 %v519_v18, %v1334_v11 }
 0x9d8   :  { %1169 = vtanh.f32 %v522_v19  ;;  %v1086_v24 = vmul.f32 -1.442695, %v523_v20  ;;  %v1085_v28 = vmul.f32 -1.442695, %v522_v19 }
 0x9d9   :  { %1171 = vtanh.f32 %v523_v20 }
 0x9da   :  { %1173 = vpow2.f32 %v1086_v24 }
 0x9db   :  { %v515_v21 = vpop.f32.mrf.mxu0 }
 0x9de   :  { %v1170_v22 = vpop.eup %1169 }
 0x9df   :  { %v1172_v23 = vpop.eup %1171  ;;  %574 = vrot.lane.b32.xlu1 %v1170_v22, %s1286_s0 }
 0x9e0   :  { %576 = vrot.lane.b32.xlu2 %v1172_v23, %s1286_s0  ;;  %v1174_v25 = vpop.eup %1173 }
 0x9e1   :  { %v531_v26 = vadd.f32 1.0, %v1174_v25 }
 0x9e3   :  { %1175 = vrcp.f32 %v531_v26  ;;  %v558_v35 = vand.u32 2147483648, %v531_v26  ;;  %vm552_vm10 = vweird.f32 %v531_v26  ;;  %v556_v36 = vand.u32 2147483647, %v531_v26 }
 0x9e4   :  { %1177 = vpow2.f32 %v1085_v28 }
 0x9e5   :  { %v559_v38 = vor.u32 1.1754944e-38, %v558_v35  ;;  %vm557_vm14 = vcmp.eq.f32.partialorder %v556_v36, 8.507059e+37 }
 0x9e9   :  { %v1176_v27 = vpop.eup %1175 }
 0x9ea   :  { %v548_v29 = vmul.f32 %v1176_v27, %v531_v26  ;;  %v1178_v31 = vpop.eup %1177  ;;  %vm553_vm9 = vweird.f32 %v1176_v27 }
 0x9eb   :  { %v530_v33 = vadd.f32 1.0, %v1178_v31  ;;  %vm554_vm13 = vmor %vm552_vm10, %vm553_vm9 }
 0x9ec   :  { %v549_v30 = vsub.f32 1.0, %v548_v29 }
 0x9ed   :  { %1179 = vrcp.f32 %v530_v33  ;;  %v543_v49 = vand.u32 2147483648, %v530_v33  ;;  %vm537_vm1 = vweird.f32 %v530_v33  ;;  %v541_v50 = vand.u32 2147483647, %v530_v33 }
 0x9ee   :  { %v550_v32 = vmul.f32 %v1176_v27, %v549_v30 }
 0x9ef   :  { %v544_v53 = vor.u32 1.1754944e-38, %v543_v49  ;;  %vm542_vm3 = vcmp.eq.f32.partialorder %v541_v50, 8.507059e+37 }
 0x9f0   :  { %v551_v34 = vadd.f32 %v1176_v27, %v550_v32 }
 0x9f2   :  { %v555_v37 = vsel %vm554_vm13, %v1176_v27, %v551_v34 }
 0x9f3   :  { %v560_v40 = vsel %vm557_vm14, %v559_v38, %v555_v37  ;;  %v1180_v41 = vpop.eup %1179 }
 0x9f4   :  { %v533_v43 = vmul.f32 %v1180_v41, %v530_v33  ;;  %vm538_vm15 = vweird.f32 %v1180_v41  ;;  %v571_v59 = vmul.f32 %v567_v58, %v560_v40 }
 0x9f5   :  { %vm539_vm2 = vmor %vm537_vm1, %vm538_vm15 }
 0x9f6   :  { %v534_v44 = vsub.f32 1.0, %v533_v43 }
 0x9f8   :  { %v535_v45 = vmul.f32 %v1180_v41, %v534_v44 }
 0x9fa   :  { %v536_v46 = vadd.f32 %v1180_v41, %v535_v45 }
 0x9fc   :  { %v540_v52 = vsel %vm539_vm2, %v1180_v41, %v536_v46 }
 0x9fd   :  { %v545_v54 = vsel %vm542_vm3, %v544_v53, %v540_v52 }
 0x9fe   :  { %v570_v1 = vmul.f32 %v566_v51, %v545_v54 }
 0xa3a   :  { %v577_v39 = vpop.permute.xlu2 %576 }
 0xa3b   :  { %v581_v42 = vmul.f32 %v577_v39, %v560_v40 }
 0xa3d   :  { %586 = vrot.lane.b32.xlu1 %v581_v42, %s1287_s3 }
 0xa51   :  { %v575_v56 = vpop.permute.xlu1 %574 }
 0xa52   :  { %v580_v48 = vmul.f32 %v575_v56, %v545_v54 }
 0xa54   :  { %584 = vrot.lane.b32.xlu0 %v580_v48, %s1287_s3 }
 0xaaf   :  { %v587_v61 = vpop.permute.xlu1 %586 }
 0xab0   :  { %v1439_v55 = vadd.f32 %v587_v61, %v571_v59 }
 0xab2   :  { %1181 = vtanh.f32 %v1439_v55 }
 0xab8   :  { %v1182_v62 = vpop.eup %1181 }
 0xab9   :  { %598 = vrot.lane.b32.xlu0 %v1182_v62, %s1286_s0 }
 0xac6   :  { %v585_v2 = vpop.permute.xlu0 %584 }
 0xac7   :  { %v1444_v4 = vadd.f32 %v585_v2, %v570_v1 }
 0xac9   :  { %1183 = vtanh.f32 %v1444_v4  ;;  %v681_v2 = vrot.slane %v1444_v4, 7 }
 0xacf   :  { %v1184_v5 = vpop.eup %1183 }
 0xad0   :  { %596 = vrot.lane.b32.xlu2 %v1184_v5, %s1286_s0  ;;  %v682_v5 = vrot.slane %v1439_v55, 7 }
 0xb2a   :  { %v597_v60 = vpop.permute.xlu2 %596 }
 0xb2b   :  { %v599_v6 = vpop.permute.xlu0 %598  ;;  %v602_v7 = vmul.f32 %v597_v60, %v545_v54 }
 0xb2c   :  { %v603_v8 = vmul.f32 %v599_v6, %v560_v40 }
 0xb2d   :  { %v604_v9 = vpack.c.bf16 %v602_v7, %v602_v7  ;;  %v979_v10 = vrot.slane %v602_v7, 4 }
 0xb2e   :  { %v605_v13 = vpack.c.bf16 %v603_v8, %v603_v8  ;;  %v980_v14 = vrot.slane %v603_v8, 3 }
 0xb2f   :  { %v608_v15 = vunpack.c.l.b16 %v604_v9 }
 0xb30   :  { %v609_v16 = vunpack.c.l.b16 %v605_v13  ;;  %v1449_v57 = vsel %vm140_vm11, %v980_v14, %v979_v10 }
 0xb31   :  { %v610_v17 = vrot.slane %v608_v15, 4 }
 0xb32   :  { %v611_v18 = vrot.slane %v609_v16, 3 }
 0xb34   :  { %v612_v19 = vsel %vm140_vm11, %v611_v18, %v610_v17 }
 0xb35   :  { %v613_v20 = vpack.c.b16 %v612_v19, %v612_v19 }
 0xb37   :  { %614 = vrot.lane.b32.xlu1 %v613_v20, %s1287_s3 }
 0xba9   :  { %v615_v21 = vpop.permute.xlu1 %614 }
 0xbaa   :  { %1087 = vmatmul.msk.bf16.vlgmr.msrb.gmra.mxu1 %vm157_vm12, %v615_v21 }
 0xc27   :  { %v628_v22 = vpop.f32.mrf.mxu1 }
 0xc28   :  { %v633_v23 = vrot.slane %v628_v22, 3  ;;  %v634_v24 = vrot.slane %v628_v22, 4 }
 0xc2a   :  { %v637_v25 = vadd.f32 %v633_v23, %v1337_v12  ;;  %v638_v26 = vadd.f32 %v634_v24, %v1334_v11 }
 0xc2c   :  { %1185 = vtanh.f32 %v637_v25  ;;  %v1088_v30 = vmul.f32 -1.442695, %v637_v25  ;;  %v1089_v34 = vmul.f32 -1.442695, %v638_v26 }
 0xc2d   :  { %1187 = vtanh.f32 %v638_v26 }
 0xc2e   :  { %1189 = vpow2.f32 %v1088_v30 }
 0xc2f   :  { %v630_v27 = vpop.f32.mrf.mxu1 }
 0xc32   :  { %v1186_v28 = vpop.eup %1185 }
 0xc33   :  { %v1188_v29 = vpop.eup %1187  ;;  %689 = vrot.lane.b32.xlu2 %v1186_v28, %s1286_s0 }
 0xc34   :  { %691 = vrot.lane.b32.xlu0 %v1188_v29, %s1286_s0  ;;  %v1190_v31 = vpop.eup %1189 }
 0xc35   :  { %v645_v32 = vadd.f32 1.0, %v1190_v31 }
 0xc37   :  { %1191 = vrcp.f32 %v645_v32  ;;  %v658_v41 = vand.u32 2147483648, %v645_v32  ;;  %vm652_vm5 = vweird.f32 %v645_v32  ;;  %v656_v42 = vand.u32 2147483647, %v645_v32 }
 0xc38   :  { %1193 = vpow2.f32 %v1089_v34 }
 0xc39   :  { %v659_v44 = vor.u32 1.1754944e-38, %v658_v41  ;;  %vm657_vm7 = vcmp.eq.f32.partialorder %v656_v42, 8.507059e+37 }
 0xc3d   :  { %v1192_v33 = vpop.eup %1191 }
 0xc3e   :  { %v648_v35 = vmul.f32 %v1192_v33, %v645_v32  ;;  %v1194_v38 = vpop.eup %1193  ;;  %vm653_vm4 = vweird.f32 %v1192_v33 }
 0xc3f   :  { %v646_v39 = vadd.f32 1.0, %v1194_v38  ;;  %vm654_vm6 = vmor %vm652_vm5, %vm653_vm4 }
 0xc40   :  { %v649_v36 = vsub.f32 1.0, %v648_v35 }
 0xc41   :  { %1195 = vrcp.f32 %v646_v39  ;;  %v673_v48 = vand.u32 2147483648, %v646_v39  ;;  %vm667_vm9 = vweird.f32 %v646_v39  ;;  %v671_v58 = vand.u32 2147483647, %v646_v39 }
 0xc42   :  { %v650_v37 = vmul.f32 %v1192_v33, %v649_v36 }
 0xc43   :  { %v674_v61 = vor.u32 1.1754944e-38, %v673_v48  ;;  %vm672_vm13 = vcmp.eq.f32.partialorder %v671_v58, 8.507059e+37 }
 0xc44   :  { %v651_v40 = vadd.f32 %v1192_v33, %v650_v37 }
 0xc46   :  { %v655_v43 = vsel %vm654_vm6, %v1192_v33, %v651_v40 }
 0xc47   :  { %v660_v46 = vsel %vm657_vm7, %v659_v44, %v655_v43  ;;  %v1196_v50 = vpop.eup %1195 }
 0xc48   :  { %v663_v52 = vmul.f32 %v1196_v50, %v646_v39  ;;  %vm668_vm8 = vweird.f32 %v1196_v50  ;;  %v685_v60 = vmul.f32 %v681_v2, %v660_v46 }
 0xc49   :  { %vm669_vm10 = vmor %vm667_vm9, %vm668_vm8 }
 0xc4a   :  { %v664_v53 = vsub.f32 1.0, %v663_v52 }
 0xc4c   :  { %v665_v56 = vmul.f32 %v1196_v50, %v664_v53 }
 0xc4e   :  { %v666_v54 = vadd.f32 %v1196_v50, %v665_v56 }
 0xc50   :  { %v670_v59 = vsel %vm669_vm10, %v1196_v50, %v666_v54 }
 0xc51   :  { %v675_v51 = vsel %vm672_vm13, %v674_v61, %v670_v59 }
 0xc52   :  { %v686_v6 = vmul.f32 %v682_v5, %v675_v51 }
 0xc8d   :  { %v690_v45 = vpop.permute.xlu2 %689 }
 0xc8e   :  { %v695_v49 = vmul.f32 %v690_v45, %v660_v46 }
 0xc90   :  { %699 = vrot.lane.b32.xlu1 %v695_v49, %s1287_s3 }
 0xca6   :  { %v692_v62 = vpop.permute.xlu0 %691 }
 0xca7   :  { %v696_v1 = vmul.f32 %v692_v62, %v675_v51 }
 0xca9   :  { %701 = vrot.lane.b32.xlu2 %v696_v1, %s1287_s3 }
 0xd02   :  { %v700_v7 = vpop.permute.xlu1 %699 }
 0xd03   :  { %v702_v8 = vpop.permute.xlu2 %701  ;;  %v1462_v9 = vadd.f32 %v700_v7, %v685_v60 }
 0xd04   :  { %v1464_v10 = vadd.f32 %v702_v8, %v686_v6 }
 0xd05   :  { %1197 = vtanh.f32 %v1462_v9 }
 0xd06   :  { %1199 = vtanh.f32 %v1464_v10 }
 0xd0b   :  { %v1198_v13 = vpop.eup %1197 }
 0xd0c   :  { %v1200_v14 = vpop.eup %1199  ;;  %711 = vrot.lane.b32.xlu0 %v1198_v13, %s1286_s0 }
 0xd0d   :  { %713 = vrot.lane.b32.xlu1 %v1200_v14, %s1286_s0  ;;  %v796_v14 = vrot.slane %v1462_v9, 7 }
 0xd7e   :  { %v712_v4 = vpop.permute.xlu0 %711 }
 0xd7f   :  { %v714_v55 = vpop.permute.xlu1 %713  ;;  %v717_v15 = vmul.f32 %v712_v4, %v660_v46 }
 0xd80   :  { %v718_v16 = vmul.f32 %v714_v55, %v675_v51 }
 0xd81   :  { %v719_v17 = vpack.c.bf16 %v717_v15, %v717_v15  ;;  %v987_v18 = vrot.slane %v717_v15, 5 }
 0xd82   :  { %v720_v19 = vpack.c.bf16 %v718_v16, %v718_v16  ;;  %v988_v20 = vrot.slane %v718_v16, 4 }
 0xd83   :  { %v723_v21 = vunpack.c.l.b16 %v719_v17  ;;  %v797_v17 = vrot.slane %v1464_v10, 7 }
 0xd84   :  { %v724_v22 = vunpack.c.l.b16 %v720_v19  ;;  %v1471_v23 = vsel %vm140_vm11, %v988_v20, %v987_v18 }
 0xd85   :  { %v725_v24 = vrot.slane %v723_v21, 5 }
 0xd86   :  { %v726_v25 = vrot.slane %v724_v22, 4 }
 0xd88   :  { %v727_v26 = vsel %vm140_vm11, %v726_v25, %v725_v24 }
 0xd89   :  { %v728_v27 = vpack.c.b16 %v727_v26, %v727_v26 }
 0xd8b   :  { %729 = vrot.lane.b32.xlu2 %v728_v27, %s1287_s3 }
 0xde5   :  { %v730_v28 = vpop.permute.xlu2 %729 }
 0xde6   :  { %1090 = vmatmul.msk.bf16.vlgmr.msrb.gmra.mxu2 %vm157_vm12, %v730_v28 }
 0xe69   :  { %v743_v29 = vpop.f32.mrf.mxu2 }
 0xe6a   :  { %v748_v30 = vrot.slane %v743_v29, 2  ;;  %v749_v31 = vrot.slane %v743_v29, 3 }
 0xe6c   :  { %v752_v32 = vadd.f32 %v748_v30, %v1337_v12  ;;  %v753_v33 = vadd.f32 %v749_v31, %v1334_v11 }
 0xe6e   :  { %1201 = vtanh.f32 %v752_v32  ;;  %v1091_v37 = vmul.f32 -1.442695, %v752_v32  ;;  %v1092_v38 = vmul.f32 -1.442695, %v753_v33 }
 0xe6f   :  { %1203 = vtanh.f32 %v753_v33 }
 0xe70   :  { %1205 = vpow2.f32 %v1091_v37 }
 0xe71   :  { %v745_v34 = vpop.f32.mrf.mxu2  ;;  %1207 = vpow2.f32 %v1092_v38 }
 0xe74   :  { %v1202_v35 = vpop.eup %1201 }
 0xe75   :  { %v1204_v36 = vpop.eup %1203  ;;  %804 = vrot.lane.b32.xlu0 %v1202_v35, %s1286_s0 }
 0xe76   :  { %806 = vrot.lane.b32.xlu1 %v1204_v36, %s1286_s0  ;;  %v1206_v39 = vpop.eup %1205 }
 0xe77   :  { %v1208_v40 = vpop.eup %1207  ;;  %v760_v41 = vadd.f32 1.0, %v1206_v39 }
 0xe78   :  { %v761_v42 = vadd.f32 1.0, %v1208_v40 }
 0xe79   :  { %1209 = vrcp.f32 %v760_v41  ;;  %v773_v48 = vand.u32 2147483648, %v760_v41  ;;  %vm767_vm1 = vweird.f32 %v760_v41  ;;  %v771_v59 = vand.u32 2147483647, %v760_v41 }
 0xe7a   :  { %1211 = vrcp.f32 %v761_v42  ;;  %v788_v58 = vand.u32 2147483648, %v761_v42  ;;  %vm782_vm2 = vweird.f32 %v761_v42  ;;  %v786_v61 = vand.u32 2147483647, %v761_v42 }
 0xe7b   :  { %v774_v1 = vor.u32 1.1754944e-38, %v773_v48  ;;  %vm772_vm5 = vcmp.eq.f32.partialorder %v771_v59, 8.507059e+37 }
 0xe7c   :  { %v789_v2 = vor.u32 1.1754944e-38, %v788_v58  ;;  %vm787_vm6 = vcmp.eq.f32.partialorder %v786_v61, 8.507059e+37 }
 0xe7f   :  { %v1210_v43 = vpop.eup %1209 }
 0xe80   :  { %v1212_v44 = vpop.eup %1211  ;;  %v763_v45 = vmul.f32 %v1210_v43, %v760_v41  ;;  %vm768_vm14 = vweird.f32 %v1210_v43 }
 0xe81   :  { %v778_v46 = vmul.f32 %v1212_v44, %v761_v42  ;;  %vm783_vm15 = vweird.f32 %v1212_v44  ;;  %vm769_vm3 = vmor %vm767_vm1, %vm768_vm14 }
 0xe82   :  { %v764_v49 = vsub.f32 1.0, %v763_v45  ;;  %vm784_vm4 = vmor %vm782_vm2, %vm783_vm15  ;;  %vm1008_vm2 = vcmask 523264  }
 0xe83   :  { %v779_v50 = vsub.f32 1.0, %v778_v46 }
 0xe84   :  { %v765_v52 = vmul.f32 %v1210_v43, %v764_v49 }
 0xe85   :  { %v780_v53 = vmul.f32 %v1212_v44, %v779_v50 }
 0xe86   :  { %v766_v56 = vadd.f32 %v1210_v43, %v765_v52 }
 0xe87   :  { %v781_v54 = vadd.f32 %v1212_v44, %v780_v53 }
 0xe88   :  { %v770_v62 = vsel %vm769_vm3, %v1210_v43, %v766_v56  ;;  %vm1010_vm3 = vcmask 785408  }
 0xe89   :  { %v785_v51 = vsel %vm784_vm4, %v1212_v44, %v781_v54  ;;  %v775_v60 = vsel %vm772_vm5, %v774_v1, %v770_v62 }
 0xe8a   :  { %v790_v7 = vsel %vm787_vm6, %v789_v2, %v785_v51  ;;  %v800_v4 = vmul.f32 %v796_v14, %v775_v60 }
 0xe8b   :  { %v801_v18 = vmul.f32 %v797_v17, %v790_v7 }
 0xee7   :  { %v805_v5 = vpop.permute.xlu0 %804 }
 0xee8   :  { %v807_v6 = vpop.permute.xlu1 %806  ;;  %v810_v8 = vmul.f32 %v805_v5, %v775_v60 }
 0xee9   :  { %v811_v13 = vmul.f32 %v807_v6, %v790_v7 }
 0xeea   :  { %814 = vrot.lane.b32.xlu2 %v810_v8, %s1287_s3 }
 0xeeb   :  { %816 = vrot.lane.b32.xlu0 %v811_v13, %s1287_s3 }
 0xf44   :  { %v815_v55 = vpop.permute.xlu2 %814 }
 0xf45   :  { %v1483_v15 = vadd.f32 %v815_v55, %v800_v4 }
 0xf47   :  { %1213 = vtanh.f32 %v1483_v15 }
 0xf4d   :  { %v1214_v16 = vpop.eup %1213 }
 0xf4e   :  { %826 = vrot.lane.b32.xlu1 %v1214_v16, %s1286_s0 }
 0xf5d   :  { %v817_v19 = vpop.permute.xlu0 %816 }
 0xf5e   :  { %v1488_v20 = vadd.f32 %v817_v19, %v801_v18 }
 0xf60   :  { %1215 = vtanh.f32 %v1488_v20 }
 0xf66   :  { %v1216_v21 = vpop.eup %1215 }
 0xf67   :  { %828 = vrot.lane.b32.xlu2 %v1216_v21, %s1286_s0 }
 0xfc0   :  { %v827_v9 = vpop.permute.xlu1 %826 }
 0xfc1   :  { %v829_v22 = vpop.permute.xlu2 %828  ;;  %v832_v24 = vmul.f32 %v827_v9, %v775_v60 }
 0xfc2   :  { %v833_v25 = vmul.f32 %v829_v22, %v790_v7 }
 0xfc3   :  { %v834_v26 = vpack.c.bf16 %v832_v24, %v832_v24  ;;  %v995_v27 = vrot.slane %v832_v24, 6 }
 0xfc4   :  { %v835_v28 = vpack.c.bf16 %v833_v25, %v833_v25  ;;  %v996_v29 = vrot.slane %v833_v25, 5 }
 0xfc5   :  { %v838_v30 = vunpack.c.l.b16 %v834_v26 }
 0xfc6   :  { %v839_v31 = vunpack.c.l.b16 %v835_v28  ;;  %v1493_v10 = vsel %vm140_vm11, %v996_v29, %v995_v27 }
 0xfc7   :  { %v840_v32 = vrot.slane %v838_v30, 6 }
 0xfc8   :  { %v841_v33 = vrot.slane %v839_v31, 5 }
 0xfca   :  { %v842_v34 = vsel %vm140_vm11, %v841_v33, %v840_v32 }
 0xfcb   :  { %v843_v35 = vpack.c.b16 %v842_v34, %v842_v34 }
 0xfcd   :  { %844 = vrot.lane.b32.xlu0 %v843_v35, %s1287_s3 }
0x103f   :  { %v845_v36 = vpop.permute.xlu0 %844 }
0x1040   :  { %1093 = vmatmul.msk.bf16.vlgmr.msrb.gmra.mxu3 %vm157_vm12, %v845_v36 }
0x10c3   :  { %v858_v37 = vpop.f32.mrf.mxu3 }
0x10c4   :  { %v863_v38 = vrot.slane %v858_v37, 1  ;;  %v864_v39 = vrot.slane %v858_v37, 2 }
0x10c6   :  { %v867_v40 = vadd.f32 %v863_v38, %v1337_v12  ;;  %v868_v41 = vadd.f32 %v864_v39, %v1334_v11 }
0x10c8   :  { %1217 = vtanh.f32 %v867_v40  ;;  %v1094_v45 = vmul.f32 -1.442695, %v867_v40  ;;  %v1095_v52 = vmul.f32 -1.442695, %v868_v41 }
0x10c9   :  { %1219 = vtanh.f32 %v868_v41 }
0x10ca   :  { %1221 = vpow2.f32 %v1094_v45 }
0x10cb   :  { %v860_v42 = vpop.f32.mrf.mxu3 }
0x10ce   :  { %v1218_v43 = vpop.eup %1217 }
0x10cf   :  { %v1220_v44 = vpop.eup %1219  ;;  %919 = vrot.lane.b32.xlu2 %v1218_v43, %s1286_s0 }
0x10d0   :  { %921 = vrot.lane.b32.xlu1 %v1220_v44, %s1286_s0  ;;  %v1222_v46 = vpop.eup %1221 }
0x10d1   :  { %v875_v49 = vadd.f32 1.0, %v1222_v46 }
0x10d3   :  { %1223 = vrcp.f32 %v875_v49  ;;  %v888_v58 = vand.u32 2147483648, %v875_v49  ;;  %vm882_vm8 = vweird.f32 %v875_v49  ;;  %v886_v59 = vand.u32 2147483647, %v875_v49 }
0x10d4   :  { %1225 = vpow2.f32 %v1095_v52 }
0x10d5   :  { %v889_v62 = vor.u32 1.1754944e-38, %v888_v58  ;;  %vm887_vm10 = vcmp.eq.f32.partialorder %v886_v59, 8.507059e+37 }
0x10d9   :  { %v1224_v50 = vpop.eup %1223 }
0x10da   :  { %v878_v53 = vmul.f32 %v1224_v50, %v875_v49  ;;  %v1226_v56 = vpop.eup %1225  ;;  %vm883_vm7 = vweird.f32 %v1224_v50 }
0x10db   :  { %v876_v54 = vadd.f32 1.0, %v1226_v56  ;;  %vm884_vm9 = vmor %vm882_vm8, %vm883_vm7 }
0x10dc   :  { %v879_v12 = vsub.f32 1.0, %v878_v53 }
0x10dd   :  { %1227 = vrcp.f32 %v876_v54  ;;  %v903_v13 = vand.u32 2147483648, %v876_v54  ;;  %vm897_vm14 = vweird.f32 %v876_v54  ;;  %v901_v14 = vand.u32 2147483647, %v876_v54 }
0x10de   :  { %v880_v11 = vmul.f32 %v1224_v50, %v879_v12 }
0x10df   :  { %v904_v55 = vor.u32 1.1754944e-38, %v903_v13  ;;  %vm902_vm1 = vcmp.eq.f32.partialorder %v901_v14, 8.507059e+37 }
0x10e0   :  { %v881_v48 = vadd.f32 %v1224_v50, %v880_v11 }
0x10e2   :  { %v885_v61 = vsel %vm884_vm9, %v1224_v50, %v881_v48 }
0x10e3   :  { %v890_v1 = vsel %vm887_vm10, %v889_v62, %v885_v61  ;;  %v1228_v5 = vpop.eup %1227 }
0x10e4   :  { %v893_v60 = vmul.f32 %v1228_v5, %v876_v54  ;;  %vm898_vm13 = vweird.f32 %v1228_v5 }
0x10e5   :  { %vm899_vm15 = vmor %vm897_vm14, %vm898_vm13 }
0x10e6   :  { %v894_v6 = vsub.f32 1.0, %v893_v60 }
0x10e8   :  { %v895_v7 = vmul.f32 %v1228_v5, %v894_v6 }
0x10ea   :  { %v896_v8 = vadd.f32 %v1228_v5, %v895_v7 }
0x10ec   :  { %v900_v4 = vsel %vm899_vm15, %v1228_v5, %v896_v8 }
0x10ed   :  { %v905_v17 = vsel %vm902_vm1, %v904_v55, %v900_v4 }
0x1129   :  { %v920_v51 = vpop.permute.xlu2 %919 }
0x112a   :  { %v925_v2 = vmul.f32 %v920_v51, %v890_v1 }
0x112c   :  { %929 = vrot.lane.b32.xlu1 %v925_v2, %s1287_s3 }
0x1134   :  { %982 = vrot.lane.b32.xlu1 %v1449_v57, %s1287_s3  ;;  %v911_v57 = vrot.slane %v1483_v15, 7 }
0x1136   :  { %v915_v19 = vmul.f32 %v911_v57, %v890_v1 }
0x113c   :  { %953 = vrot.lane.b32.xlu1 %v1361_v63, %s1287_s3  ;;  %v912_v63 = vrot.slane %v1488_v20, 7 }
0x113e   :  { %v916_v24 = vmul.f32 %v912_v63, %v905_v17 }
0x1142   :  { %v922_v16 = vpop.permute.xlu1 %921 }
0x1143   :  { %v926_v18 = vmul.f32 %v922_v16, %v905_v17 }
0x1145   :  { %931 = vrot.lane.b32.xlu0 %v926_v18, %s1287_s3 }
0x119e   :  { %v930_v21 = vpop.permute.xlu1 %929 }
0x119f   :  { %v935_v9 = vadd.f32 %v930_v21, %v915_v19 }
0x11a1   :  { %1229 = vtanh.f32 %v935_v9 }
0x11a7   :  { %v1230_v22 = vpop.eup %1229 }
0x11a8   :  { %941 = vrot.lane.b32.xlu0 %v1230_v22, %s1286_s0 }
0x11b0   :  { %998 = vrot.lane.b32.xlu0 %v1493_v10, %s1288_s2 }
0x11b7   :  { %v932_v25 = vpop.permute.xlu0 %931 }
0x11b8   :  { %v936_v26 = vadd.f32 %v932_v25, %v916_v24  ;;  %968 = vrot.lane.b32.xlu0 %v1405_v3, %s1288_s2  ;;  %v983_v3 = vpop.permute.xlu1 %982 }
0x11ba   :  { %1231 = vtanh.f32 %v936_v26 }
0x11c0   :  { %v1232_v27 = vpop.eup %1231  ;;  %v954_v37 = vpop.permute.xlu1 %953 }
0x11c1   :  { %943 = vrot.lane.b32.xlu2 %v1232_v27, %s1286_s0 }
0x11c9   :  { %990 = vrot.lane.b32.xlu2 %v1471_v23, %s1286_s0 }
0x11d1   :  { %960 = vrot.lane.b32.xlu2 %v1383_v0, %s1286_s0 }
0x121a   :  { %v942_v15 = vpop.permute.xlu0 %941 }
0x121b   :  { %v944_v28 = vpop.permute.xlu2 %943  ;;  %v947_v29 = vmul.f32 %v942_v15, %v890_v1 }
0x121c   :  { %v948_v30 = vmul.f32 %v944_v28, %v905_v17 }
0x121d   :  { %1022 = vrot.lane.b32.xlu1 %v947_v29, %s1287_s3  ;;  %v1003_v23 = vrot.slane %v947_v29, 7 }
0x121e   :  { %v1021_v20 = vrot.slane %v948_v30, 7  ;;  %v1004_v33 = vrot.slane %v948_v30, 6 }
0x1220   :  { %1024 = vrot.lane.b32.xlu2 %v1021_v20, %s1287_s3  ;;  %v1005_v0 = vsel %vm140_vm11, %v1004_v33, %v1003_v23  ;;  %vm1030_vm11 = vcmask 253952  }
0x1222   :  { %v999_v31 = vpop.permute.xlu0 %998 }
0x1223   :  { %v991_v10 = vpop.permute.xlu2 %990 }
0x1224   :  { %v1012_v32 = vsel %vm157_vm12, %v983_v3, %v991_v10 }
0x1225   :  { %v1013_v34 = vsel %vm1008_vm2, %v1012_v32, %v999_v31 }
0x1226   :  { %v1014_v35 = vsel %vm1010_vm3, %v1013_v34, %v1005_v0 }
0x1227   :  { %v1017_v40 = vrot.slane %v1014_v35, 6 }
0x122a   :  { %v969_v36 = vpop.permute.xlu0 %968 }
0x122b   :  { %v961_v38 = vpop.permute.xlu2 %960 }
0x122c   :  { %v1007_v39 = vsel %vm157_vm12, %v954_v37, %v961_v38  ;;  %vm1028_vm12 = vcmask 261127  }
0x122d   :  { %v1009_v41 = vsel %vm1008_vm2, %v1007_v39, %v969_v36 }
0x122e   :  { %v1011_v42 = vsel %vm1010_vm3, %v1009_v41, %v1427_v47 }
0x122f   :  { %v1018_v43 = vsel %vm34_vm0, %v1011_v42, %v1017_v40 }
0x1230   :  { %1020 = vst [vmem:[#allocation2] sm:$0xf] %v1018_v43 }
0x1231   :  { %1042 = dma.vmem_to_hbm [thread:$0]  %s1038_s30, 64, %s1040_s8, [#allocation3]  }
0x127a   :  { %v1025_v44 = vpop.permute.xlu2 %1024 }
0x127b   :  { %1031 = vst.msk [vmem:[#allocation4 + $0x1] sm:$0x1] %vm1030_vm11, %v1025_v44 }
0x128f   :  { %v1023_v45 = vpop.permute.xlu1 %1022 }
0x1290   :  { %1029 = vst.msk [vmem:[#allocation4 - $0x7] sm:$0x80] %vm1028_vm12, %v1023_v45 }
0x1291   :  { %1053 = dma.vmem_to_hbm [thread:$0]  %s1049_s10, 32, %s1051_s4, [#allocation5]  }
0x1292   :  { %1281 = dma.done.wait [#allocation3], 64  }
0x1293   :  { %1282 = vsyncadd [#allocation3], 4294967232 }
0x1294   :  { %1283 = dma.done.wait [#allocation5], 32  }
0x1295   :  { %1284 = vsyncadd [#allocation5], 4294967264 }
0x1296   :  { %1062 = vsyncpa [#allocation3], 1 }
0x1297   :  { %1063 = vsyncpa [#allocation5], 1 }

</bundles_post_ra>
